<compile_context>
chip_gen: v7x
topology: tpu7x:2x2x1
jax: 0.10.0
libtpu: 0.0.40
codegen_flags: <defaults>
</compile_context>

<pallas_src>
import numpy as np

import jax
import jax.numpy as jnp
from jax.experimental import pallas as pl
from jax.experimental.pallas import tpu as pltpu


def _round_up(n, m):
    return ((n + m - 1) // m) * m


def _pad_contraction(n):
    # K-dims: v6e/v7x MXUs are 2x256x256, so pad to 256 once n exceeds 128
    # (K=128 only fills half the systolic depth there); v5e is matched at 128.
    return _round_up(n, 256) if n > 128 else 128


def _pick_chunk(seq, cap, bp):
    """Largest divisor of seq <= cap (prefer bf16-friendly sublane multiples)."""
    cap = max(1, min(seq, cap))
    for t in range(cap, 0, -1):
        if seq % t == 0 and (t * bp) % 16 == 0:
            return t
    for t in range(cap, 0, -1):
        if seq % t == 0:
            return t
    return 1


def _feature_lstm_kernel(x_ref, wih_ref, whh_ref, b_ref, wout_ref, bout_ref,
                         out_ref, pre_sc, h_sc, c_sc):
    c_idx = pl.program_id(0)
    bp, hp = h_sc.shape
    t_chunk = x_ref.shape[0] // bp

    # (0) Zero the recurrent state at the first chunk only.
    @pl.when(c_idx == 0)
    def _():
        h_sc[...] = jnp.zeros_like(h_sc)
        c_sc[...] = jnp.zeros_like(c_sc)

    # (1) Input projection for every timestep of this chunk in ONE bf16 MXU
    #     matmul (f32 accumulation), bias folded in once.  x is pre-flattened
    #     by the wrapper and pre_sc is 2-D -> no in-kernel reshape/relayout.
    pre_sc[...] = (
        jnp.dot(x_ref[...], wih_ref[...], preferred_element_type=jnp.float32)
        + b_ref[...]
    )

    whh = whh_ref[...]  # bf16 recurrent weight, loaded once, reused every step

    # (2) Serial recurrence.  Partial unroll keeps LLO scheduling visibility
    #     without exploding instruction memory at long sequences.  Only the
    #     dot operands are bf16; gates / c / h stay f32 (v5e-safe).
    def step(t, carry):
        h_prev, c_prev = carry
        off = pl.multiple_of(t * bp, bp)
        gates = pre_sc[pl.ds(off, bp), :] + jnp.dot(
            h_prev.astype(jnp.bfloat16), whh,
            preferred_element_type=jnp.float32)
        # hp is a multiple of 128, so every gate slice is lane-aligned.
        i_g = jax.nn.sigmoid(gates[:, 0 * hp:1 * hp])
        f_g = jax.nn.sigmoid(gates[:, 1 * hp:2 * hp])
        g_g = jnp.tanh(gates[:, 2 * hp:3 * hp])
        o_g = jax.nn.sigmoid(gates[:, 3 * hp:4 * hp])
        c_new = f_g * c_prev + i_g * g_g
        h_new = o_g * jnp.tanh(c_new)
        return h_new, c_new

    h_last, c_last = jax.lax.fori_loop(
        0, t_chunk, step, (h_sc[...], c_sc[...]), unroll=min(t_chunk, 8))

    # Carry the state to the next chunk.
    h_sc[...] = h_last
    c_sc[...] = c_last

    # (3) hidden_to_tags + softmax on the LAST chunk only.  f32 head; exact
    #     divide (once per call, off the critical path).  Padded classes carry
    #     a -1e30 bias -> exp() == 0, so the softmax normalizes over the real
    #     classes only.
    @pl.when(c_idx == pl.num_programs(0) - 1)
    def _():
        tags = (jnp.dot(h_last, wout_ref[...],
                        preferred_element_type=jnp.float32) + bout_ref[...])
        m = jnp.max(tags, axis=-1, keepdims=True)
        e = jnp.exp(tags - m)
        out_ref[...] = (e / jnp.sum(e, axis=-1, keepdims=True)).astype(out_ref.dtype)


def prepare_feature_lstm_params(w_ih, w_hh, b_ih, b_hh, w_out, b_out):
    """One-time host-side packing of PyTorch-layout LSTM/Linear weights into
    padded, pre-transposed, lane-aligned Pallas operands (hoisted out of the
    per-call path)."""
    hidden = w_hh.shape[1]
    feat = w_ih.shape[1]
    n_classes = w_out.shape[0]

    fp = _pad_contraction(feat)
    hp = _pad_contraction(hidden)
    cp = _round_up(n_classes, 128)

    w_ih = np.asarray(w_ih, np.float32)
    w_hh = np.asarray(w_hh, np.float32)
    b_sum = np.asarray(b_ih, np.float32) + np.asarray(b_hh, np.float32)
    w_out = np.asarray(w_out, np.float32)
    b_out = np.asarray(b_out, np.float32)

    # PyTorch packs gates [i, f, g, o] along dim 0 of w_ih / w_hh.  Gate g
    # occupies lanes [g*hp, g*hp + hidden) of the padded layout.  Padded
    # lanes/rows are zero, so the padded hidden/cell state stays exactly 0 for
    # all timesteps (sigmoid(0)*0 + sigmoid(0)*tanh(0) = 0).
    wih_pad = np.zeros((fp, 4 * hp), np.float32)
    whh_pad = np.zeros((hp, 4 * hp), np.float32)
    b_pad = np.zeros((1, 4 * hp), np.float32)
    for g in range(4):
        wih_pad[:feat, g * hp:g * hp + hidden] = w_ih[g * hidden:(g + 1) * hidden, :].T
        whh_pad[:hidden, g * hp:g * hp + hidden] = w_hh[g * hidden:(g + 1) * hidden, :].T
        b_pad[0, g * hp:g * hp + hidden] = b_sum[g * hidden:(g + 1) * hidden]

    # Output head stays f32 (off the critical path); padded classes get a
    # -1e30 bias so they vanish under softmax (safe in f32; do not cast to bf16).
    wout_pad = np.zeros((hp, cp), np.float32)
    wout_pad[:hidden, :n_classes] = w_out.T
    bout_pad = np.full((1, cp), -1e30, np.float32)
    bout_pad[0, :n_classes] = b_out

    return {
        "wih": jnp.asarray(wih_pad, jnp.bfloat16),   # MXU operands -> bf16
        "whh": jnp.asarray(whh_pad, jnp.bfloat16),
        "b": jnp.asarray(b_pad),                     # f32 bias
        "wout": jnp.asarray(wout_pad),               # f32 head
        "bout": jnp.asarray(bout_pad),
        "hidden": hidden, "feat": feat, "n_classes": n_classes,
        "fp": fp, "hp": hp, "cp": cp,
    }


def feature_lstm_forward(x, params):
    """x: (seq, batch, feature) f32. Returns softmax tag scores (batch, n_classes)."""
    seq, batch, feat = x.shape
    assert feat == params["feat"]
    fp, hp, cp = params["fp"], params["hp"], params["cp"]
    n_classes = params["n_classes"]
    f32 = jnp.float32

    bp = _round_up(batch, 8)  # sublane width

    # Zero-pad features and flatten time*batch so the kernel never reshapes:
    # each seq-chunk is a contiguous, tile-aligned row range of this 2-D slab.
    x_pad = jnp.zeros((seq, bp, fp), jnp.bfloat16)
    x_pad = x_pad.at[:, :batch, :feat].set(x.astype(jnp.bfloat16))
    x_flat = x_pad.reshape(seq * bp, fp)

    # Chunk the sequence so the pre-activation scratch stays bounded
    # (target <= ~4 MiB) instead of scaling with the whole sequence.
    max_steps = max(1, (4 << 20) // (bp * 4 * hp * 4))
    t_chunk = _pick_chunk(seq, max_steps, bp)
    n_chunks = seq // t_chunk

    # Single-buffer the constant weight operands once they are large enough to
    # matter (default double-buffering would waste VMEM on v7x's 64 MiB at
    # hidden ~1-2k); at toy sizes leave the default pipelining alone.
    weight_bytes = ((params["wih"].size + params["whh"].size) * 2
                    + (params["wout"].size + params["b"].size
                       + params["bout"].size) * 4)
    const_mode = pl.Buffered(1) if weight_bytes > (4 << 20) else None

    def const_spec(shape):
        if const_mode is None:
            return pl.BlockSpec(shape, lambda c: (0, 0))
        return pl.BlockSpec(shape, lambda c: (0, 0), pipeline_mode=const_mode)

    # Explicit scoped-VMEM budget from the actual working set (+50% headroom).
    vmem_bytes = int(1.5 * (
        2 * t_chunk * bp * fp * 2                      # x chunk (bf16, 2 bufs)
        + (1 if const_mode is not None else 2) * weight_bytes
        + t_chunk * bp * 4 * hp * 4                    # pre-activation scratch
        + 2 * bp * hp * 4                              # h / c state
        + 2 * bp * cp * 4))                            # output
    vmem_bytes = min(max(vmem_bytes, 16 << 20), 128 << 20)

    out_pad = pl.pallas_call(
        _feature_lstm_kernel,
        out_shape=jax.ShapeDtypeStruct((bp, cp), f32),
        grid=(n_chunks,),
        in_specs=[
            pl.BlockSpec((t_chunk * bp, fp), lambda c: (c, 0)),
            const_spec((fp, 4 * hp)),
            const_spec((hp, 4 * hp)),
            const_spec((1, 4 * hp)),
            const_spec((hp, cp)),
            const_spec((1, cp)),
        ],
        out_specs=pl.BlockSpec((bp, cp), lambda c: (0, 0)),
        scratch_shapes=[
            pltpu.VMEM((t_chunk * bp, 4 * hp), f32),   # pre-activations (chunk)
            pltpu.VMEM((bp, hp), f32),                 # h carry
            pltpu.VMEM((bp, hp), f32),                 # c carry
        ],
        compiler_params=pltpu.CompilerParams(
            dimension_semantics=("arbitrary",),        # serial recurrence carry
            vmem_limit_bytes=vmem_bytes),
    )(x_flat, params["wih"], params["whh"], params["b"],
      params["wout"], params["bout"])

    return out_pad[:batch, :n_classes]


def _reference_forward(x, w_ih, w_hh, b_ih, b_hh, w_out, b_out):
    """Pure-JAX f32 reference matching torch.nn.LSTM + Linear + softmax."""
    seq, batch, feat = x.shape
    hidden = w_hh.shape[1]
    h = jnp.zeros((batch, hidden), jnp.float32)
    c = jnp.zeros((batch, hidden), jnp.float32)
    for t in range(seq):
        gates = x[t] @ w_ih.T + h @ w_hh.T + b_ih + b_hh
        i_g = jax.nn.sigmoid(gates[:, 0 * hidden:1 * hidden])
        f_g = jax.nn.sigmoid(gates[:, 1 * hidden:2 * hidden])
        g_g = jnp.tanh(gates[:, 2 * hidden:3 * hidden])
        o_g = jax.nn.sigmoid(gates[:, 3 * hidden:4 * hidden])
        c = f_g * c + i_g * g_g
        h = o_g * jnp.tanh(c)
    tags = h @ w_out.T + b_out
    return jax.nn.softmax(tags, axis=-1)


if __name__ == "__main__":
    # Small, deterministic config.
    feature_size = 32
    hidden_size = 32
    n_classes = 8
    seq_len = 8
    batch_size = 2

    key = jax.random.PRNGKey(0)
    k_x, k_wih, k_whh, k_bih, k_bhh, k_wo, k_bo = jax.random.split(key, 7)

    x = jax.random.normal(k_x, (seq_len, batch_size, feature_size), jnp.float32)

    scale = 1.0 / jnp.sqrt(hidden_size)
    w_ih = jax.random.uniform(k_wih, (4 * hidden_size, feature_size),
                              jnp.float32, -scale, scale)
    w_hh = jax.random.uniform(k_whh, (4 * hidden_size, hidden_size),
                              jnp.float32, -scale, scale)
    b_ih = jax.random.uniform(k_bih, (4 * hidden_size,), jnp.float32, -scale, scale)
    b_hh = jax.random.uniform(k_bhh, (4 * hidden_size,), jnp.float32, -scale, scale)
    w_out = jax.random.uniform(k_wo, (n_classes, hidden_size),
                               jnp.float32, -scale, scale)
    b_out = jax.random.uniform(k_bo, (n_classes,), jnp.float32, -scale, scale)

    # One-time weight prep (hoisted out of the per-call path), then forward.
    params = prepare_feature_lstm_params(w_ih, w_hh, b_ih, b_hh, w_out, b_out)
    out = feature_lstm_forward(x, params)
    out = jax.block_until_ready(out)

    ref = _reference_forward(x, w_ih, w_hh, b_ih, b_hh, w_out, b_out)
    assert out.shape == (batch_size, n_classes)
    # Tolerance accounts for bf16 MXU operands (x/W_ih and h/W_hh) with f32
    # accumulation; everything else (gates, state, head, softmax) is exact f32.
    assert jnp.allclose(out, ref, atol=5e-3, rtol=5e-3), "mismatch vs reference"

    print("KERNEL_OK")
</pallas_src>

<mosaic_0001>
module attributes {stable_mosaic.version = 11 : i64} {
  func.func @_feature_lstm_kernel(%arg0: i32, %arg1: memref<64x128xbf16, #tpu.memory_space<vmem>>, %arg2: memref<128x512xbf16, #tpu.memory_space<vmem>>, %arg3: memref<128x512xbf16, #tpu.memory_space<vmem>>, %arg4: memref<1x512xf32, #tpu.memory_space<vmem>>, %arg5: memref<128x128xf32, #tpu.memory_space<vmem>>, %arg6: memref<1x128xf32, #tpu.memory_space<vmem>>, %arg7: memref<8x128xf32, #tpu.memory_space<vmem>>, %arg8: memref<64x512xf32, #tpu.memory_space<vmem>>, %arg9: memref<8x128xf32, #tpu.memory_space<vmem>>, %arg10: memref<8x128xf32, #tpu.memory_space<vmem>>) attributes {dimension_semantics = [#tpu.dimension_semantics<arbitrary>], iteration_bounds = array<i64: 1>, scalar_prefetch = 0 : i64, scratch_operands = 3 : i64, tpu.core_type = #tpu.core_type<tc>, window_params = [{transform_indices = @transform_0, window_bounds = array<i64: 64, 128>}, {pipeline_mode = #tpu.pipeline_mode<synchronous>, transform_indices = @transform_1, window_bounds = array<i64: 128, 512>}, {pipeline_mode = #tpu.pipeline_mode<synchronous>, transform_indices = @transform_2, window_bounds = array<i64: 128, 512>}, {pipeline_mode = #tpu.pipeline_mode<synchronous>, transform_indices = @transform_3, window_bounds = array<i64: 1, 512>}, {pipeline_mode = #tpu.pipeline_mode<synchronous>, transform_indices = @transform_4, window_bounds = array<i64: 128, 128>}, {pipeline_mode = #tpu.pipeline_mode<synchronous>, transform_indices = @transform_5, window_bounds = array<i64: 1, 128>}, {pipeline_mode = #tpu.pipeline_mode<synchronous>, transform_indices = @transform_6, window_bounds = array<i64: 8, 128>}]} {
    %c0_i32 = arith.constant 0 : i32
    %0 = arith.cmpi eq, %arg0, %c0_i32 : i32
    %1 = arith.extui %0 : i1 to i32
    %c0_i32_0 = arith.constant 0 : i32
    %2 = arith.cmpi ne, %1, %c0_i32_0 : i32
    scf.if %2 {
      %cst_69 = arith.constant 0.000000e+00 : f32
      %274 = vector.broadcast %cst_69 : f32 to vector<8x128xf32>
      %c0_70 = arith.constant 0 : index
      %c0_71 = arith.constant 0 : index
      %275 = vector.load %arg9[%c0_70, %c0_71] : memref<8x128xf32, #tpu.memory_space<vmem>>, vector<8x128xf32>
      tpu.vector_store %arg9[%c0_70, %c0_71], %274 {strides = array<i32>} : memref<8x128xf32, #tpu.memory_space<vmem>>, vector<8x128xf32>,
      %cst_72 = arith.constant 0.000000e+00 : f32
      %276 = vector.broadcast %cst_72 : f32 to vector<8x128xf32>
      %c0_73 = arith.constant 0 : index
      %c0_74 = arith.constant 0 : index
      %277 = vector.load %arg10[%c0_73, %c0_74] : memref<8x128xf32, #tpu.memory_space<vmem>>, vector<8x128xf32>
      tpu.vector_store %arg10[%c0_73, %c0_74], %276 {strides = array<i32>} : memref<8x128xf32, #tpu.memory_space<vmem>>, vector<8x128xf32>,
    } else {
    }
    %c0 = arith.constant 0 : index
    %c0_1 = arith.constant 0 : index
    %3 = vector.load %arg1[%c0, %c0_1] : memref<64x128xbf16, #tpu.memory_space<vmem>>, vector<64x128xbf16>
    %c0_2 = arith.constant 0 : index
    %c0_3 = arith.constant 0 : index
    %4 = vector.load %arg2[%c0_2, %c0_3] : memref<128x512xbf16, #tpu.memory_space<vmem>>, vector<128x512xbf16>
    %cst = arith.constant dense<0.000000e+00> : vector<64x512xf32>
    %5 = tpu.matmul %3, %4, %cst {dimension_numbers = #tpu.dot_dimension_numbers<[1], [0], [0], [1], [0, 0, 1, 1], [], []>} : vector<64x128xbf16>, vector<128x512xbf16>, vector<64x512xf32> -> vector<64x512xf32>
    %c0_4 = arith.constant 0 : index
    %c0_5 = arith.constant 0 : index
    %6 = vector.load %arg4[%c0_4, %c0_5] : memref<1x512xf32, #tpu.memory_space<vmem>>, vector<1x512xf32>
    %7 = vector.broadcast %6 : vector<1x512xf32> to vector<64x512xf32>
    %8 = arith.addf %5, %7 : vector<64x512xf32>
    %c0_6 = arith.constant 0 : index
    %c0_7 = arith.constant 0 : index
    %9 = vector.load %arg8[%c0_6, %c0_7] : memref<64x512xf32, #tpu.memory_space<vmem>>, vector<64x512xf32>
    tpu.vector_store %arg8[%c0_6, %c0_7], %8 {strides = array<i32>} : memref<64x512xf32, #tpu.memory_space<vmem>>, vector<64x512xf32>,
    %c0_8 = arith.constant 0 : index
    %c0_9 = arith.constant 0 : index
    %10 = vector.load %arg3[%c0_8, %c0_9] : memref<128x512xbf16, #tpu.memory_space<vmem>>, vector<128x512xbf16>
    %c0_10 = arith.constant 0 : index
    %c0_11 = arith.constant 0 : index
    %11 = vector.load %arg9[%c0_10, %c0_11] : memref<8x128xf32, #tpu.memory_space<vmem>>, vector<8x128xf32>
    %c0_12 = arith.constant 0 : index
    %c0_13 = arith.constant 0 : index
    %12 = vector.load %arg10[%c0_12, %c0_13] : memref<8x128xf32, #tpu.memory_space<vmem>>, vector<8x128xf32>
    %c0_i32_14 = arith.constant 0 : i32
    %c8_i32 = arith.constant 8 : i32
    %13 = arith.muli %c0_i32_14, %c8_i32 : i32
    %14 = tpu.assume_multiple %13, 8 : i32
    %15 = arith.index_cast %14 : i32 to index
    %c0_15 = arith.constant 0 : index
    %16 = vector.load %arg8[%15, %c0_15] : memref<64x512xf32, #tpu.memory_space<vmem>>, vector<8x512xf32>
    %17 = arith.truncf %11 : vector<8x128xf32> to vector<8x128xbf16>
    %cst_16 = arith.constant dense<0.000000e+00> : vector<8x512xf32>
    %18 = tpu.matmul %17, %10, %cst_16 {dimension_numbers = #tpu.dot_dimension_numbers<[1], [0], [0], [1], [0, 0, 1, 1], [], []>} : vector<8x128xbf16>, vector<128x512xbf16>, vector<8x512xf32> -> vector<8x512xf32>
    %19 = arith.addf %16, %18 : vector<8x512xf32>
    %20 = vector.extract_strided_slice %19 {offsets = [0, 0], sizes = [8, 128], strides = [1, 1]} : vector<8x512xf32> to vector<8x128xf32>
    %21 = arith.negf %20 : vector<8x128xf32>
    %22 = math.exp %21 : vector<8x128xf32>
    %cst_17 = arith.constant 1.000000e+00 : f32
    %23 = vector.broadcast %cst_17 : f32 to vector<8x128xf32>
    %24 = arith.addf %23, %22 : vector<8x128xf32>
    %25 = arith.divf %23, %24 : vector<8x128xf32>
    %26 = vector.extract_strided_slice %19 {offsets = [0, 128], sizes = [8, 128], strides = [1, 1]} : vector<8x512xf32> to vector<8x128xf32>
    %27 = arith.negf %26 : vector<8x128xf32>
    %28 = math.exp %27 : vector<8x128xf32>
    %cst_18 = arith.constant 1.000000e+00 : f32
    %29 = vector.broadcast %cst_18 : f32 to vector<8x128xf32>
    %30 = arith.addf %29, %28 : vector<8x128xf32>
    %31 = arith.divf %29, %30 : vector<8x128xf32>
    %32 = vector.extract_strided_slice %19 {offsets = [0, 256], sizes = [8, 128], strides = [1, 1]} : vector<8x512xf32> to vector<8x128xf32>
    %33 = math.tanh %32 : vector<8x128xf32>
    %34 = vector.extract_strided_slice %19 {offsets = [0, 384], sizes = [8, 128], strides = [1, 1]} : vector<8x512xf32> to vector<8x128xf32>
    %35 = arith.negf %34 : vector<8x128xf32>
    %36 = math.exp %35 : vector<8x128xf32>
    %cst_19 = arith.constant 1.000000e+00 : f32
    %37 = vector.broadcast %cst_19 : f32 to vector<8x128xf32>
    %38 = arith.addf %37, %36 : vector<8x128xf32>
    %39 = arith.divf %37, %38 : vector<8x128xf32>
    %40 = arith.mulf %31, %12 : vector<8x128xf32>
    %41 = arith.mulf %25, %33 : vector<8x128xf32>
    %42 = arith.addf %40, %41 : vector<8x128xf32>
    %43 = math.tanh %42 : vector<8x128xf32>
    %44 = arith.mulf %39, %43 : vector<8x128xf32>
    %c1_i32 = arith.constant 1 : i32
    %c8_i32_20 = arith.constant 8 : i32
    %45 = arith.muli %c1_i32, %c8_i32_20 : i32
    %46 = tpu.assume_multiple %45, 8 : i32
    %47 = arith.index_cast %46 : i32 to index
    %c0_21 = arith.constant 0 : index
    %48 = vector.load %arg8[%47, %c0_21] : memref<64x512xf32, #tpu.memory_space<vmem>>, vector<8x512xf32>
    %49 = arith.truncf %44 : vector<8x128xf32> to vector<8x128xbf16>
    %cst_22 = arith.constant dense<0.000000e+00> : vector<8x512xf32>
    %50 = tpu.matmul %49, %10, %cst_22 {dimension_numbers = #tpu.dot_dimension_numbers<[1], [0], [0], [1], [0, 0, 1, 1], [], []>} : vector<8x128xbf16>, vector<128x512xbf16>, vector<8x512xf32> -> vector<8x512xf32>
    %51 = arith.addf %48, %50 : vector<8x512xf32>
    %52 = vector.extract_strided_slice %51 {offsets = [0, 0], sizes = [8, 128], strides = [1, 1]} : vector<8x512xf32> to vector<8x128xf32>
    %53 = arith.negf %52 : vector<8x128xf32>
    %54 = math.exp %53 : vector<8x128xf32>
    %cst_23 = arith.constant 1.000000e+00 : f32
    %55 = vector.broadcast %cst_23 : f32 to vector<8x128xf32>
    %56 = arith.addf %55, %54 : vector<8x128xf32>
    %57 = arith.divf %55, %56 : vector<8x128xf32>
    %58 = vector.extract_strided_slice %51 {offsets = [0, 128], sizes = [8, 128], strides = [1, 1]} : vector<8x512xf32> to vector<8x128xf32>
    %59 = arith.negf %58 : vector<8x128xf32>
    %60 = math.exp %59 : vector<8x128xf32>
    %cst_24 = arith.constant 1.000000e+00 : f32
    %61 = vector.broadcast %cst_24 : f32 to vector<8x128xf32>
    %62 = arith.addf %61, %60 : vector<8x128xf32>
    %63 = arith.divf %61, %62 : vector<8x128xf32>
    %64 = vector.extract_strided_slice %51 {offsets = [0, 256], sizes = [8, 128], strides = [1, 1]} : vector<8x512xf32> to vector<8x128xf32>
    %65 = math.tanh %64 : vector<8x128xf32>
    %66 = vector.extract_strided_slice %51 {offsets = [0, 384], sizes = [8, 128], strides = [1, 1]} : vector<8x512xf32> to vector<8x128xf32>
    %67 = arith.negf %66 : vector<8x128xf32>
    %68 = math.exp %67 : vector<8x128xf32>
    %cst_25 = arith.constant 1.000000e+00 : f32
    %69 = vector.broadcast %cst_25 : f32 to vector<8x128xf32>
    %70 = arith.addf %69, %68 : vector<8x128xf32>
    %71 = arith.divf %69, %70 : vector<8x128xf32>
    %72 = arith.mulf %63, %42 : vector<8x128xf32>
    %73 = arith.mulf %57, %65 : vector<8x128xf32>
    %74 = arith.addf %72, %73 : vector<8x128xf32>
    %75 = math.tanh %74 : vector<8x128xf32>
    %76 = arith.mulf %71, %75 : vector<8x128xf32>
    %c2_i32 = arith.constant 2 : i32
    %c8_i32_26 = arith.constant 8 : i32
    %77 = arith.muli %c2_i32, %c8_i32_26 : i32
    %78 = tpu.assume_multiple %77, 8 : i32
    %79 = arith.index_cast %78 : i32 to index
    %c0_27 = arith.constant 0 : index
    %80 = vector.load %arg8[%79, %c0_27] : memref<64x512xf32, #tpu.memory_space<vmem>>, vector<8x512xf32>
    %81 = arith.truncf %76 : vector<8x128xf32> to vector<8x128xbf16>
    %cst_28 = arith.constant dense<0.000000e+00> : vector<8x512xf32>
    %82 = tpu.matmul %81, %10, %cst_28 {dimension_numbers = #tpu.dot_dimension_numbers<[1], [0], [0], [1], [0, 0, 1, 1], [], []>} : vector<8x128xbf16>, vector<128x512xbf16>, vector<8x512xf32> -> vector<8x512xf32>
    %83 = arith.addf %80, %82 : vector<8x512xf32>
    %84 = vector.extract_strided_slice %83 {offsets = [0, 0], sizes = [8, 128], strides = [1, 1]} : vector<8x512xf32> to vector<8x128xf32>
    %85 = arith.negf %84 : vector<8x128xf32>
    %86 = math.exp %85 : vector<8x128xf32>
    %cst_29 = arith.constant 1.000000e+00 : f32
    %87 = vector.broadcast %cst_29 : f32 to vector<8x128xf32>
    %88 = arith.addf %87, %86 : vector<8x128xf32>
    %89 = arith.divf %87, %88 : vector<8x128xf32>
    %90 = vector.extract_strided_slice %83 {offsets = [0, 128], sizes = [8, 128], strides = [1, 1]} : vector<8x512xf32> to vector<8x128xf32>
    %91 = arith.negf %90 : vector<8x128xf32>
    %92 = math.exp %91 : vector<8x128xf32>
    %cst_30 = arith.constant 1.000000e+00 : f32
    %93 = vector.broadcast %cst_30 : f32 to vector<8x128xf32>
    %94 = arith.addf %93, %92 : vector<8x128xf32>
    %95 = arith.divf %93, %94 : vector<8x128xf32>
    %96 = vector.extract_strided_slice %83 {offsets = [0, 256], sizes = [8, 128], strides = [1, 1]} : vector<8x512xf32> to vector<8x128xf32>
    %97 = math.tanh %96 : vector<8x128xf32>
    %98 = vector.extract_strided_slice %83 {offsets = [0, 384], sizes = [8, 128], strides = [1, 1]} : vector<8x512xf32> to vector<8x128xf32>
    %99 = arith.negf %98 : vector<8x128xf32>
    %100 = math.exp %99 : vector<8x128xf32>
    %cst_31 = arith.constant 1.000000e+00 : f32
    %101 = vector.broadcast %cst_31 : f32 to vector<8x128xf32>
    %102 = arith.addf %101, %100 : vector<8x128xf32>
    %103 = arith.divf %101, %102 : vector<8x128xf32>
    %104 = arith.mulf %95, %74 : vector<8x128xf32>
    %105 = arith.mulf %89, %97 : vector<8x128xf32>
    %106 = arith.addf %104, %105 : vector<8x128xf32>
    %107 = math.tanh %106 : vector<8x128xf32>
    %108 = arith.mulf %103, %107 : vector<8x128xf32>
    %c3_i32 = arith.constant 3 : i32
    %c8_i32_32 = arith.constant 8 : i32
    %109 = arith.muli %c3_i32, %c8_i32_32 : i32
    %110 = tpu.assume_multiple %109, 8 : i32
    %111 = arith.index_cast %110 : i32 to index
    %c0_33 = arith.constant 0 : index
    %112 = vector.load %arg8[%111, %c0_33] : memref<64x512xf32, #tpu.memory_space<vmem>>, vector<8x512xf32>
    %113 = arith.truncf %108 : vector<8x128xf32> to vector<8x128xbf16>
    %cst_34 = arith.constant dense<0.000000e+00> : vector<8x512xf32>
    %114 = tpu.matmul %113, %10, %cst_34 {dimension_numbers = #tpu.dot_dimension_numbers<[1], [0], [0], [1], [0, 0, 1, 1], [], []>} : vector<8x128xbf16>, vector<128x512xbf16>, vector<8x512xf32> -> vector<8x512xf32>
    %115 = arith.addf %112, %114 : vector<8x512xf32>
    %116 = vector.extract_strided_slice %115 {offsets = [0, 0], sizes = [8, 128], strides = [1, 1]} : vector<8x512xf32> to vector<8x128xf32>
    %117 = arith.negf %116 : vector<8x128xf32>
    %118 = math.exp %117 : vector<8x128xf32>
    %cst_35 = arith.constant 1.000000e+00 : f32
    %119 = vector.broadcast %cst_35 : f32 to vector<8x128xf32>
    %120 = arith.addf %119, %118 : vector<8x128xf32>
    %121 = arith.divf %119, %120 : vector<8x128xf32>
    %122 = vector.extract_strided_slice %115 {offsets = [0, 128], sizes = [8, 128], strides = [1, 1]} : vector<8x512xf32> to vector<8x128xf32>
    %123 = arith.negf %122 : vector<8x128xf32>
    %124 = math.exp %123 : vector<8x128xf32>
    %cst_36 = arith.constant 1.000000e+00 : f32
    %125 = vector.broadcast %cst_36 : f32 to vector<8x128xf32>
    %126 = arith.addf %125, %124 : vector<8x128xf32>
    %127 = arith.divf %125, %126 : vector<8x128xf32>
    %128 = vector.extract_strided_slice %115 {offsets = [0, 256], sizes = [8, 128], strides = [1, 1]} : vector<8x512xf32> to vector<8x128xf32>
    %129 = math.tanh %128 : vector<8x128xf32>
    %130 = vector.extract_strided_slice %115 {offsets = [0, 384], sizes = [8, 128], strides = [1, 1]} : vector<8x512xf32> to vector<8x128xf32>
    %131 = arith.negf %130 : vector<8x128xf32>
    %132 = math.exp %131 : vector<8x128xf32>
    %cst_37 = arith.constant 1.000000e+00 : f32
    %133 = vector.broadcast %cst_37 : f32 to vector<8x128xf32>
    %134 = arith.addf %133, %132 : vector<8x128xf32>
    %135 = arith.divf %133, %134 : vector<8x128xf32>
    %136 = arith.mulf %127, %106 : vector<8x128xf32>
    %137 = arith.mulf %121, %129 : vector<8x128xf32>
    %138 = arith.addf %136, %137 : vector<8x128xf32>
    %139 = math.tanh %138 : vector<8x128xf32>
    %140 = arith.mulf %135, %139 : vector<8x128xf32>
    %c4_i32 = arith.constant 4 : i32
    %c8_i32_38 = arith.constant 8 : i32
    %141 = arith.muli %c4_i32, %c8_i32_38 : i32
    %142 = tpu.assume_multiple %141, 8 : i32
    %143 = arith.index_cast %142 : i32 to index
    %c0_39 = arith.constant 0 : index
    %144 = vector.load %arg8[%143, %c0_39] : memref<64x512xf32, #tpu.memory_space<vmem>>, vector<8x512xf32>
    %145 = arith.truncf %140 : vector<8x128xf32> to vector<8x128xbf16>
    %cst_40 = arith.constant dense<0.000000e+00> : vector<8x512xf32>
    %146 = tpu.matmul %145, %10, %cst_40 {dimension_numbers = #tpu.dot_dimension_numbers<[1], [0], [0], [1], [0, 0, 1, 1], [], []>} : vector<8x128xbf16>, vector<128x512xbf16>, vector<8x512xf32> -> vector<8x512xf32>
    %147 = arith.addf %144, %146 : vector<8x512xf32>
    %148 = vector.extract_strided_slice %147 {offsets = [0, 0], sizes = [8, 128], strides = [1, 1]} : vector<8x512xf32> to vector<8x128xf32>
    %149 = arith.negf %148 : vector<8x128xf32>
    %150 = math.exp %149 : vector<8x128xf32>
    %cst_41 = arith.constant 1.000000e+00 : f32
    %151 = vector.broadcast %cst_41 : f32 to vector<8x128xf32>
    %152 = arith.addf %151, %150 : vector<8x128xf32>
    %153 = arith.divf %151, %152 : vector<8x128xf32>
    %154 = vector.extract_strided_slice %147 {offsets = [0, 128], sizes = [8, 128], strides = [1, 1]} : vector<8x512xf32> to vector<8x128xf32>
    %155 = arith.negf %154 : vector<8x128xf32>
    %156 = math.exp %155 : vector<8x128xf32>
    %cst_42 = arith.constant 1.000000e+00 : f32
    %157 = vector.broadcast %cst_42 : f32 to vector<8x128xf32>
    %158 = arith.addf %157, %156 : vector<8x128xf32>
    %159 = arith.divf %157, %158 : vector<8x128xf32>
    %160 = vector.extract_strided_slice %147 {offsets = [0, 256], sizes = [8, 128], strides = [1, 1]} : vector<8x512xf32> to vector<8x128xf32>
    %161 = math.tanh %160 : vector<8x128xf32>
    %162 = vector.extract_strided_slice %147 {offsets = [0, 384], sizes = [8, 128], strides = [1, 1]} : vector<8x512xf32> to vector<8x128xf32>
    %163 = arith.negf %162 : vector<8x128xf32>
    %164 = math.exp %163 : vector<8x128xf32>
    %cst_43 = arith.constant 1.000000e+00 : f32
    %165 = vector.broadcast %cst_43 : f32 to vector<8x128xf32>
    %166 = arith.addf %165, %164 : vector<8x128xf32>
    %167 = arith.divf %165, %166 : vector<8x128xf32>
    %168 = arith.mulf %159, %138 : vector<8x128xf32>
    %169 = arith.mulf %153, %161 : vector<8x128xf32>
    %170 = arith.addf %168, %169 : vector<8x128xf32>
    %171 = math.tanh %170 : vector<8x128xf32>
    %172 = arith.mulf %167, %171 : vector<8x128xf32>
    %c5_i32 = arith.constant 5 : i32
    %c8_i32_44 = arith.constant 8 : i32
    %173 = arith.muli %c5_i32, %c8_i32_44 : i32
    %174 = tpu.assume_multiple %173, 8 : i32
    %175 = arith.index_cast %174 : i32 to index
    %c0_45 = arith.constant 0 : index
    %176 = vector.load %arg8[%175, %c0_45] : memref<64x512xf32, #tpu.memory_space<vmem>>, vector<8x512xf32>
    %177 = arith.truncf %172 : vector<8x128xf32> to vector<8x128xbf16>
    %cst_46 = arith.constant dense<0.000000e+00> : vector<8x512xf32>
    %178 = tpu.matmul %177, %10, %cst_46 {dimension_numbers = #tpu.dot_dimension_numbers<[1], [0], [0], [1], [0, 0, 1, 1], [], []>} : vector<8x128xbf16>, vector<128x512xbf16>, vector<8x512xf32> -> vector<8x512xf32>
    %179 = arith.addf %176, %178 : vector<8x512xf32>
    %180 = vector.extract_strided_slice %179 {offsets = [0, 0], sizes = [8, 128], strides = [1, 1]} : vector<8x512xf32> to vector<8x128xf32>
    %181 = arith.negf %180 : vector<8x128xf32>
    %182 = math.exp %181 : vector<8x128xf32>
    %cst_47 = arith.constant 1.000000e+00 : f32
    %183 = vector.broadcast %cst_47 : f32 to vector<8x128xf32>
    %184 = arith.addf %183, %182 : vector<8x128xf32>
    %185 = arith.divf %183, %184 : vector<8x128xf32>
    %186 = vector.extract_strided_slice %179 {offsets = [0, 128], sizes = [8, 128], strides = [1, 1]} : vector<8x512xf32> to vector<8x128xf32>
    %187 = arith.negf %186 : vector<8x128xf32>
    %188 = math.exp %187 : vector<8x128xf32>
    %cst_48 = arith.constant 1.000000e+00 : f32
    %189 = vector.broadcast %cst_48 : f32 to vector<8x128xf32>
    %190 = arith.addf %189, %188 : vector<8x128xf32>
    %191 = arith.divf %189, %190 : vector<8x128xf32>
    %192 = vector.extract_strided_slice %179 {offsets = [0, 256], sizes = [8, 128], strides = [1, 1]} : vector<8x512xf32> to vector<8x128xf32>
    %193 = math.tanh %192 : vector<8x128xf32>
    %194 = vector.extract_strided_slice %179 {offsets = [0, 384], sizes = [8, 128], strides = [1, 1]} : vector<8x512xf32> to vector<8x128xf32>
    %195 = arith.negf %194 : vector<8x128xf32>
    %196 = math.exp %195 : vector<8x128xf32>
    %cst_49 = arith.constant 1.000000e+00 : f32
    %197 = vector.broadcast %cst_49 : f32 to vector<8x128xf32>
    %198 = arith.addf %197, %196 : vector<8x128xf32>
    %199 = arith.divf %197, %198 : vector<8x128xf32>
    %200 = arith.mulf %191, %170 : vector<8x128xf32>
    %201 = arith.mulf %185, %193 : vector<8x128xf32>
    %202 = arith.addf %200, %201 : vector<8x128xf32>
    %203 = math.tanh %202 : vector<8x128xf32>
    %204 = arith.mulf %199, %203 : vector<8x128xf32>
    %c6_i32 = arith.constant 6 : i32
    %c8_i32_50 = arith.constant 8 : i32
    %205 = arith.muli %c6_i32, %c8_i32_50 : i32
    %206 = tpu.assume_multiple %205, 8 : i32
    %207 = arith.index_cast %206 : i32 to index
    %c0_51 = arith.constant 0 : index
    %208 = vector.load %arg8[%207, %c0_51] : memref<64x512xf32, #tpu.memory_space<vmem>>, vector<8x512xf32>
    %209 = arith.truncf %204 : vector<8x128xf32> to vector<8x128xbf16>
    %cst_52 = arith.constant dense<0.000000e+00> : vector<8x512xf32>
    %210 = tpu.matmul %209, %10, %cst_52 {dimension_numbers = #tpu.dot_dimension_numbers<[1], [0], [0], [1], [0, 0, 1, 1], [], []>} : vector<8x128xbf16>, vector<128x512xbf16>, vector<8x512xf32> -> vector<8x512xf32>
    %211 = arith.addf %208, %210 : vector<8x512xf32>
    %212 = vector.extract_strided_slice %211 {offsets = [0, 0], sizes = [8, 128], strides = [1, 1]} : vector<8x512xf32> to vector<8x128xf32>
    %213 = arith.negf %212 : vector<8x128xf32>
    %214 = math.exp %213 : vector<8x128xf32>
    %cst_53 = arith.constant 1.000000e+00 : f32
    %215 = vector.broadcast %cst_53 : f32 to vector<8x128xf32>
    %216 = arith.addf %215, %214 : vector<8x128xf32>
    %217 = arith.divf %215, %216 : vector<8x128xf32>
    %218 = vector.extract_strided_slice %211 {offsets = [0, 128], sizes = [8, 128], strides = [1, 1]} : vector<8x512xf32> to vector<8x128xf32>
    %219 = arith.negf %218 : vector<8x128xf32>
    %220 = math.exp %219 : vector<8x128xf32>
    %cst_54 = arith.constant 1.000000e+00 : f32
    %221 = vector.broadcast %cst_54 : f32 to vector<8x128xf32>
    %222 = arith.addf %221, %220 : vector<8x128xf32>
    %223 = arith.divf %221, %222 : vector<8x128xf32>
    %224 = vector.extract_strided_slice %211 {offsets = [0, 256], sizes = [8, 128], strides = [1, 1]} : vector<8x512xf32> to vector<8x128xf32>
    %225 = math.tanh %224 : vector<8x128xf32>
    %226 = vector.extract_strided_slice %211 {offsets = [0, 384], sizes = [8, 128], strides = [1, 1]} : vector<8x512xf32> to vector<8x128xf32>
    %227 = arith.negf %226 : vector<8x128xf32>
    %228 = math.exp %227 : vector<8x128xf32>
    %cst_55 = arith.constant 1.000000e+00 : f32
    %229 = vector.broadcast %cst_55 : f32 to vector<8x128xf32>
    %230 = arith.addf %229, %228 : vector<8x128xf32>
    %231 = arith.divf %229, %230 : vector<8x128xf32>
    %232 = arith.mulf %223, %202 : vector<8x128xf32>
    %233 = arith.mulf %217, %225 : vector<8x128xf32>
    %234 = arith.addf %232, %233 : vector<8x128xf32>
    %235 = math.tanh %234 : vector<8x128xf32>
    %236 = arith.mulf %231, %235 : vector<8x128xf32>
    %c7_i32 = arith.constant 7 : i32
    %c8_i32_56 = arith.constant 8 : i32
    %237 = arith.muli %c7_i32, %c8_i32_56 : i32
    %238 = tpu.assume_multiple %237, 8 : i32
    %239 = arith.index_cast %238 : i32 to index
    %c0_57 = arith.constant 0 : index
    %240 = vector.load %arg8[%239, %c0_57] : memref<64x512xf32, #tpu.memory_space<vmem>>, vector<8x512xf32>
    %241 = arith.truncf %236 : vector<8x128xf32> to vector<8x128xbf16>
    %cst_58 = arith.constant dense<0.000000e+00> : vector<8x512xf32>
    %242 = tpu.matmul %241, %10, %cst_58 {dimension_numbers = #tpu.dot_dimension_numbers<[1], [0], [0], [1], [0, 0, 1, 1], [], []>} : vector<8x128xbf16>, vector<128x512xbf16>, vector<8x512xf32> -> vector<8x512xf32>
    %243 = arith.addf %240, %242 : vector<8x512xf32>
    %244 = vector.extract_strided_slice %243 {offsets = [0, 0], sizes = [8, 128], strides = [1, 1]} : vector<8x512xf32> to vector<8x128xf32>
    %245 = arith.negf %244 : vector<8x128xf32>
    %246 = math.exp %245 : vector<8x128xf32>
    %cst_59 = arith.constant 1.000000e+00 : f32
    %247 = vector.broadcast %cst_59 : f32 to vector<8x128xf32>
    %248 = arith.addf %247, %246 : vector<8x128xf32>
    %249 = arith.divf %247, %248 : vector<8x128xf32>
    %250 = vector.extract_strided_slice %243 {offsets = [0, 128], sizes = [8, 128], strides = [1, 1]} : vector<8x512xf32> to vector<8x128xf32>
    %251 = arith.negf %250 : vector<8x128xf32>
    %252 = math.exp %251 : vector<8x128xf32>
    %cst_60 = arith.constant 1.000000e+00 : f32
    %253 = vector.broadcast %cst_60 : f32 to vector<8x128xf32>
    %254 = arith.addf %253, %252 : vector<8x128xf32>
    %255 = arith.divf %253, %254 : vector<8x128xf32>
    %256 = vector.extract_strided_slice %243 {offsets = [0, 256], sizes = [8, 128], strides = [1, 1]} : vector<8x512xf32> to vector<8x128xf32>
    %257 = math.tanh %256 : vector<8x128xf32>
    %258 = vector.extract_strided_slice %243 {offsets = [0, 384], sizes = [8, 128], strides = [1, 1]} : vector<8x512xf32> to vector<8x128xf32>
    %259 = arith.negf %258 : vector<8x128xf32>
    %260 = math.exp %259 : vector<8x128xf32>
    %cst_61 = arith.constant 1.000000e+00 : f32
    %261 = vector.broadcast %cst_61 : f32 to vector<8x128xf32>
    %262 = arith.addf %261, %260 : vector<8x128xf32>
    %263 = arith.divf %261, %262 : vector<8x128xf32>
    %264 = arith.mulf %255, %234 : vector<8x128xf32>
    %265 = arith.mulf %249, %257 : vector<8x128xf32>
    %266 = arith.addf %264, %265 : vector<8x128xf32>
    %267 = math.tanh %266 : vector<8x128xf32>
    %268 = arith.mulf %263, %267 : vector<8x128xf32>
    %c8_i32_62 = arith.constant 8 : i32
    %c0_63 = arith.constant 0 : index
    %c0_64 = arith.constant 0 : index
    %269 = vector.load %arg9[%c0_63, %c0_64] : memref<8x128xf32, #tpu.memory_space<vmem>>, vector<8x128xf32>
    tpu.vector_store %arg9[%c0_63, %c0_64], %268 {strides = array<i32>} : memref<8x128xf32, #tpu.memory_space<vmem>>, vector<8x128xf32>,
    %c0_65 = arith.constant 0 : index
    %c0_66 = arith.constant 0 : index
    %270 = vector.load %arg10[%c0_65, %c0_66] : memref<8x128xf32, #tpu.memory_space<vmem>>, vector<8x128xf32>
    tpu.vector_store %arg10[%c0_65, %c0_66], %266 {strides = array<i32>} : memref<8x128xf32, #tpu.memory_space<vmem>>, vector<8x128xf32>,
    %c0_i32_67 = arith.constant 0 : i32
    %271 = arith.cmpi eq, %arg0, %c0_i32_67 : i32
    %272 = arith.extui %271 : i1 to i32
    %c0_i32_68 = arith.constant 0 : i32
    %273 = arith.cmpi ne, %272, %c0_i32_68 : i32
    scf.if %273 {
      %c0_69 = arith.constant 0 : index
      %c0_70 = arith.constant 0 : index
      %274 = vector.load %arg5[%c0_69, %c0_70] : memref<128x128xf32, #tpu.memory_space<vmem>>, vector<128x128xf32>
      %cst_71 = arith.constant dense<0.000000e+00> : vector<8x128xf32>
      %275 = tpu.matmul %268, %274, %cst_71 {dimension_numbers = #tpu.dot_dimension_numbers<[1], [0], [0], [1], [0, 0, 1, 1], [], []>} : vector<8x128xf32>, vector<128x128xf32>, vector<8x128xf32> -> vector<8x128xf32>
      %c0_72 = arith.constant 0 : index
      %c0_73 = arith.constant 0 : index
      %276 = vector.load %arg6[%c0_72, %c0_73] : memref<1x128xf32, #tpu.memory_space<vmem>>, vector<1x128xf32>
      %277 = vector.broadcast %276 : vector<1x128xf32> to vector<8x128xf32>
      %278 = arith.addf %275, %277 : vector<8x128xf32>
      %cst_74 = arith.constant dense<0xFF800000> : vector<8xf32>
      %279 = vector.multi_reduction <maximumf>, %278, %cst_74 [1] : vector<8x128xf32> to vector<8xf32>
      %280 = vector.shape_cast %279 : vector<8xf32> to vector<8x1xf32>
      %281 = vector.broadcast %280 : vector<8x1xf32> to vector<8x128xf32>
      %282 = arith.subf %278, %281 : vector<8x128xf32>
      %283 = math.exp %282 : vector<8x128xf32>
      %cst_75 = arith.constant dense<0.000000e+00> : vector<8xf32>
      %284 = vector.multi_reduction <add>, %283, %cst_75 [1] : vector<8x128xf32> to vector<8xf32>
      %285 = vector.shape_cast %284 : vector<8xf32> to vector<8x1xf32>
      %286 = vector.broadcast %285 : vector<8x1xf32> to vector<8x128xf32>
      %287 = arith.divf %283, %286 : vector<8x128xf32>
      %c0_76 = arith.constant 0 : index
      %c0_77 = arith.constant 0 : index
      %288 = vector.load %arg7[%c0_76, %c0_77] : memref<8x128xf32, #tpu.memory_space<vmem>>, vector<8x128xf32>
      tpu.vector_store %arg7[%c0_76, %c0_77], %287 {strides = array<i32>} : memref<8x128xf32, #tpu.memory_space<vmem>>, vector<8x128xf32>,
    } else {
    }
    return
  }
  func.func @transform_0(%arg0: i32) -> (i32, i32) {
    %c0_i32 = arith.constant 0 : i32
    %c0_i32_0 = arith.constant 0 : i32
    return %arg0, %c0_i32 : i32, i32
  }
  func.func @transform_1(%arg0: i32) -> (i32, i32) {
    %c0_i32 = arith.constant 0 : i32
    %c0_i32_0 = arith.constant 0 : i32
    %c0_i32_1 = arith.constant 0 : i32
    return %c0_i32, %c0_i32_0 : i32, i32
  }
  func.func @transform_2(%arg0: i32) -> (i32, i32) {
    %c0_i32 = arith.constant 0 : i32
    %c0_i32_0 = arith.constant 0 : i32
    %c0_i32_1 = arith.constant 0 : i32
    return %c0_i32, %c0_i32_0 : i32, i32
  }
  func.func @transform_3(%arg0: i32) -> (i32, i32) {
    %c0_i32 = arith.constant 0 : i32
    %c0_i32_0 = arith.constant 0 : i32
    %c0_i32_1 = arith.constant 0 : i32
    return %c0_i32, %c0_i32_0 : i32, i32
  }
  func.func @transform_4(%arg0: i32) -> (i32, i32) {
    %c0_i32 = arith.constant 0 : i32
    %c0_i32_0 = arith.constant 0 : i32
    %c0_i32_1 = arith.constant 0 : i32
    return %c0_i32, %c0_i32_0 : i32, i32
  }
  func.func @transform_5(%arg0: i32) -> (i32, i32) {
    %c0_i32 = arith.constant 0 : i32
    %c0_i32_0 = arith.constant 0 : i32
    %c0_i32_1 = arith.constant 0 : i32
    return %c0_i32, %c0_i32_0 : i32, i32
  }
  func.func @transform_6(%arg0: i32) -> (i32, i32) {
    %c0_i32 = arith.constant 0 : i32
    %c0_i32_0 = arith.constant 0 : i32
    %c0_i32_1 = arith.constant 0 : i32
    return %c0_i32, %c0_i32_0 : i32, i32
  }
}

</mosaic_0001>

<bundles_post_ra>
// kernel: tpu_custom_call.1
= control target key start
LH: loop header
LB: loop body
LE: loop exit
PB: predicated region body
PF: predicated region fallthrough
CT: control target
= control target key end

     0   :  { %11 = vsyncpa [#allocation6], 0  ;;  %s2995_s0 = inlined_call_operand.hbm [shape: bf16[64,128], index: 0, kind: input, shape index: {}]   ;;  %s2996_s1 = inlined_call_operand.hbm [shape: bf16[128,512], index: 1, kind: input, shape index: {}]   ;;  %s2997_s2 = inlined_call_operand.hbm [shape: bf16[128,512], index: 2, kind: input, shape index: {}]   ;;  %s2998_s3 = inlined_call_operand.vmem [shape: f32[1,512], index: 3, kind: input, shape index: {}]   ;;  %s2999_s4 = inlined_call_operand.hbm [shape: f32[128,128], index: 4, kind: input, shape index: {}]   ;;  %s3000_s5 = inlined_call_operand.vmem [shape: f32[1,128], index: 5, kind: input, shape index: {}]   ;;  %s3001_s6 = inlined_call_operand.hbm [shape: f32[8,128], index: 6, kind: output, shape index: {}]  }
   0x1   :  { %12 = vsyncpa [#allocation9], 0 }
   0x2   :  { %13 = vsyncpa [#allocation12], 0 }
   0x3   :  { %14 = vsyncpa [#allocation7], 0  ;;  %s2346_s21 = smov [#allocation8]   ;;  %s2228_s25 = scalar_lea.hbm %s2996_s1, 4096 }
   0x4   :  { %s32_s22 = sshll.u32 %s2346_s21, 4  ;;  %p2229_p0 = scmp.ne.s32.totalorder %s2996_s1, %s2228_s25  ;;  %s33_s22 = int_to_ptr.vmem [resolvable:$true] %s32_s22 }
   0x5   :  { %p2232_p1 = scmp.lt.u32.totalorder %s2228_s25, %s2996_s1 }
   0x7   :  { %p2234_p2 = pnand %p2232_p1, %p2229_p0 }
   0x9   :  { %2237 = shalt.err (!%p2234_p2)
}
   0xa   :  { %s2238_s30 = scalar_lea.vmem %s33_s22, 4096  ;;  %p2243_p4 = scmp.lt.s32.totalorder %s33_s22, %s33_s22 }
   0xb   :  { %p2239_p3 = scmp.ne.s32.totalorder %s33_s22, %s2238_s30  ;;  %p2244_p5 = scmp.lt.s32.totalorder %s2238_s30, %s2238_s30 }
   0xd   :  { %p2245_p6 = por %p2244_p5, %p2243_p4 }
   0xf   :  { %p2246_p7 = pnand %p2245_p6, %p2239_p3 }
  0x11   :  { %2249 = shalt.err (!%p2246_p7)
}
  0x12   :  { %s2347_s7 = smov 256   ;;  %s2348_s8 = smov 16  }
  0x13   :  { %38 = dma.hbm_to_vmem [thread:$0]  %s2996_s1, 4096, %s33_s22, [#allocation9], %s2347_s7, %s2347_s7, %s2348_s8  }
  0x14   :  { %s2349_s11 = smov [#allocation5]   ;;  %s2250_s15 = scalar_lea.hbm %s2995_s0, 512 }
  0x15   :  { %s20_s12 = sshll.u32 %s2349_s11, 4  ;;  %p2251_p8 = scmp.ne.s32.totalorder %s2995_s0, %s2250_s15  ;;  %s21_s12 = int_to_ptr.vmem [resolvable:$true] %s20_s12 }
  0x16   :  { %p2254_p9 = scmp.lt.u32.totalorder %s2250_s15, %s2995_s0 }
  0x18   :  { %p2256_p10 = pnand %p2254_p9, %p2251_p8 }
  0x1a   :  { %2259 = shalt.err (!%p2256_p10)
}
  0x1b   :  { %s2260_s20 = scalar_lea.vmem %s21_s12, 512  ;;  %p2265_p12 = scmp.lt.s32.totalorder %s21_s12, %s21_s12 }
  0x1c   :  { %p2261_p11 = scmp.ne.s32.totalorder %s21_s12, %s2260_s20  ;;  %p2266_p13 = scmp.lt.s32.totalorder %s2260_s20, %s2260_s20 }
  0x1e   :  { %p2267_p0 = por %p2266_p13, %p2265_p12 }
  0x20   :  { %p2268_p1 = pnand %p2267_p0, %p2261_p11 }
  0x22   :  { %2271 = shalt.err (!%p2268_p1)
}
  0x23   :  { %s2350_s1 = smov 64   ;;  %s2351_s21 = smov 4  }
  0x24   :  { %26 = dma.hbm_to_vmem [thread:$0]  %s2995_s0, 512, %s21_s12, [#allocation6], %s2350_s1, %s2350_s1, %s2351_s21  }
  0x25   :  { %s2352_s24 = smov [#allocation10]   ;;  %s2353_s26 = smov [#allocation11]  }
  0x26   :  { %s44_s25 = sshll.u32 %s2352_s24, 4  ;;  %s58_s27 = sshll.u32 %s2353_s26, 4  ;;  %s45_s25 = int_to_ptr.vmem [resolvable:$true] %s44_s25  ;;  %s2423_s27 = int_to_ptr.vmem [resolvable:$true] %s58_s27 }
  0x27   :  { %s2272_s30 = scalar_lea.hbm %s2997_s2, 4096 }
  0x28   :  { %p2273_p2 = scmp.ne.s32.totalorder %s2997_s2, %s2272_s30  ;;  %p2276_p3 = scmp.lt.u32.totalorder %s2272_s30, %s2997_s2 }
  0x2a   :  { %p2278_p4 = pnand %p2276_p3, %p2273_p2 }
  0x2c   :  { %2281 = shalt.err (!%p2278_p4)
}
  0x2d   :  { %s2282_s0 = scalar_lea.vmem %s45_s25, 4096  ;;  %p2287_p6 = scmp.lt.s32.totalorder %s45_s25, %s45_s25 }
  0x2e   :  { %p2283_p5 = scmp.ne.s32.totalorder %s45_s25, %s2282_s0  ;;  %p2288_p7 = scmp.lt.s32.totalorder %s2282_s0, %s2282_s0 }
  0x30   :  { %p2289_p8 = por %p2288_p7, %p2287_p6 }
  0x32   :  { %p2290_p9 = pnand %p2289_p8, %p2283_p5 }
  0x34   :  { %2293 = shalt.err (!%p2290_p9)
}
  0x35   :  { %50 = dma.hbm_to_vmem [thread:$0]  %s2997_s2, 4096, %s45_s25, [#allocation9], %s2347_s7, %s2347_s7, %s2348_s8  }
  0x36   :  { %s2294_s17 = scalar_lea.hbm %s2999_s4, 2048 }
  0x37   :  { %p2295_p10 = scmp.ne.s32.totalorder %s2999_s4, %s2294_s17  ;;  %p2298_p11 = scmp.lt.u32.totalorder %s2294_s17, %s2999_s4 }
  0x39   :  { %p2300_p12 = pnand %p2298_p11, %p2295_p10 }
  0x3b   :  { %2303 = shalt.err (!%p2300_p12)
}
  0x3c   :  { %s2304_s21 = scalar_lea.vmem %s2423_s27, 2048  ;;  %p2309_p0 = scmp.lt.s32.totalorder %s2423_s27, %s2423_s27 }
  0x3d   :  { %p2305_p13 = scmp.ne.s32.totalorder %s2423_s27, %s2304_s21  ;;  %p2310_p1 = scmp.lt.s32.totalorder %s2304_s21, %s2304_s21 }
  0x3f   :  { %p2311_p2 = por %p2310_p1, %p2309_p0 }
  0x41   :  { %p2312_p3 = pnand %p2311_p2, %p2305_p13 }
  0x43   :  { %2315 = shalt.err (!%p2312_p3)
}
  0x44   :  { %s2354_s2 = smov 128   ;;  %s2355_s7 = smov 8  }
  0x45   :  { %64 = dma.hbm_to_vmem [thread:$0]  %s2999_s4, 2048, %s2423_s27, [#allocation12], %s2354_s2, %s2354_s2, %s2355_s7  }
  0x46   :  { %2338 = dma.done.wait [#allocation6], 512  }
  0x47   :  { %2339 = vsyncadd [#allocation6], 4294966784 }
  0x48   :  { %2340 = dma.done.wait [#allocation9], 8192  }
  0x49   :  { %2341 = vsyncadd [#allocation9], 4294959104 }
  0x4a   :  { %2342 = dma.done.wait [#allocation12], 2048  }
  0x4b   :  { %2343 = vsyncadd [#allocation12], 4294965248  ;;  %v3004_v0 = vmov 0   ;;  %v1964_v1 = vld [vmem:[#allocation8 + $0x4] ss:$16 sps:$4 sm:$0xff]   ;;  %v2025_v44 = vld [vmem:[#allocation5 + $0x8] sm:$0xff]  }
  0x4c   :  { %364 = vmatprep.mubr.bf16.mxu0 %v3004_v0  ;;  %437 = vmatprep.mubr.bf16.mxu1 %v3004_v0  ;;  %v1966_v2 = vld [vmem:[#allocation8 + $0xc] ss:$16 sps:$4 sm:$0xff]   ;;  %v1968_v3 = vld [vmem:[#allocation8] ss:$16 sps:$4 sm:$0xff]   ;;  %v1969_v4 = vld [vmem:[#allocation8 + $0x8] ss:$16 sps:$4 sm:$0xff]  }
  0x4d   :  { %332 = vmatprep.subr.bf16.mxu0 %v1964_v1  ;;  %405 = vmatprep.subr.bf16.mxu1 %v1966_v2  ;;  %v1970_v5 = vld [vmem:[#allocation8 + $0x24] ss:$16 sps:$4 sm:$0xff]   ;;  %v1972_v6 = vld [vmem:[#allocation8 + $0x2c] ss:$16 sps:$4 sm:$0xff]   ;;  %v1974_v7 = vld [vmem:[#allocation8 + $0x20] ss:$16 sps:$4 sm:$0xff]  }
  0x4e   :  { %333 = vmatpush1.bf16.msra.mxu0 %v1968_v3  ;;  %406 = vmatpush1.bf16.msra.mxu1 %v1969_v4  ;;  %v1975_v8 = vld [vmem:[#allocation8 + $0x28] ss:$16 sps:$4 sm:$0xff]   ;;  %v1976_v9 = vld [vmem:[#allocation8 + $0x44] ss:$16 sps:$4 sm:$0xff]   ;;  %v1978_v10 = vld [vmem:[#allocation8 + $0x4c] ss:$16 sps:$4 sm:$0xff]  }
  0x4f   :  { %334 = vmatprep.subr.bf16.mxu0 %v1970_v5  ;;  %407 = vmatprep.subr.bf16.mxu1 %v1972_v6  ;;  %v1980_v11 = vld [vmem:[#allocation8 + $0x40] ss:$16 sps:$4 sm:$0xff]   ;;  %v1981_v12 = vld [vmem:[#allocation8 + $0x48] ss:$16 sps:$4 sm:$0xff]   ;;  %v1982_v13 = vld [vmem:[#allocation8 + $0x64] ss:$16 sps:$4 sm:$0xff]  }
  0x50   :  { %v1984_v14 = vld [vmem:[#allocation8 + $0x6c] ss:$16 sps:$4 sm:$0xff]   ;;  %v1986_v15 = vld [vmem:[#allocation8 + $0x60] ss:$16 sps:$4 sm:$0xff]   ;;  %v1987_v16 = vld [vmem:[#allocation8 + $0x68] ss:$16 sps:$4 sm:$0xff]  }
  0x51   :  { %v1988_v17 = vld [vmem:[#allocation8 + $0x84] ss:$16 sps:$4 sm:$0xff]   ;;  %v1990_v18 = vld [vmem:[#allocation8 + $0x8c] ss:$16 sps:$4 sm:$0xff]   ;;  %v1992_v19 = vld [vmem:[#allocation8 + $0x80] ss:$16 sps:$4 sm:$0xff]  }
  0x52   :  { %335 = vmatpush1.bf16.msra.mxu0 %v1974_v7  ;;  %408 = vmatpush1.bf16.msra.mxu1 %v1975_v8  ;;  %v1993_v20 = vld [vmem:[#allocation8 + $0x88] ss:$16 sps:$4 sm:$0xff]   ;;  %v1994_v21 = vld [vmem:[#allocation8 + $0xa4] ss:$16 sps:$4 sm:$0xff]   ;;  %v1996_v22 = vld [vmem:[#allocation8 + $0xac] ss:$16 sps:$4 sm:$0xff]   ;;  %v128_v7 = vlaneseq }
  0x53   :  { %336 = vmatprep.subr.bf16.mxu0 %v1976_v9  ;;  %409 = vmatprep.subr.bf16.mxu1 %v1978_v10  ;;  %v1998_v23 = vld [vmem:[#allocation8 + $0xa0] ss:$16 sps:$4 sm:$0xff]   ;;  %v1999_v24 = vld [vmem:[#allocation8 + $0xa8] ss:$16 sps:$4 sm:$0xff]   ;;  %v2000_v25 = vld [vmem:[#allocation8 + $0xc4] ss:$16 sps:$4 sm:$0xff]  }
  0x54   :  { %v2002_v26 = vld [vmem:[#allocation8 + $0xcc] ss:$16 sps:$4 sm:$0xff]   ;;  %v2004_v27 = vld [vmem:[#allocation8 + $0xc0] ss:$16 sps:$4 sm:$0xff]   ;;  %v2005_v28 = vld [vmem:[#allocation8 + $0xc8] ss:$16 sps:$4 sm:$0xff]  }
  0x55   :  { %v2006_v29 = vld [vmem:[#allocation8 + $0xe4] ss:$16 sps:$4 sm:$0xff]   ;;  %v2008_v30 = vld [vmem:[#allocation8 + $0xec] ss:$16 sps:$4 sm:$0xff]   ;;  %v2010_v31 = vld [vmem:[#allocation8 + $0xe0] ss:$16 sps:$4 sm:$0xff]  }
  0x56   :  { %337 = vmatpush1.bf16.msra.mxu0 %v1980_v11  ;;  %410 = vmatpush1.bf16.msra.mxu1 %v1981_v12  ;;  %v2011_v32 = vld [vmem:[#allocation8 + $0xe8] ss:$16 sps:$4 sm:$0xff]   ;;  %v2459_v33 = vld [vmem:[#allocation10 + $0x4] ss:$16 sps:$4 sm:$0xff]   ;;  %v2461_v34 = vld [vmem:[#allocation10 + $0xc] ss:$16 sps:$4 sm:$0xff]  }
  0x57   :  { %338 = vmatprep.subr.bf16.mxu0 %v1982_v13  ;;  %411 = vmatprep.subr.bf16.mxu1 %v1984_v14  ;;  %v2012_v35 = vld [vmem:[#allocation5] sm:$0xff]   ;;  %v2465_v37 = vld [vmem:[#allocation10 + $0x8] ss:$16 sps:$4 sm:$0xff]   ;;  %v2471_v39 = vld [vmem:[#allocation10 + $0x2c] ss:$16 sps:$4 sm:$0xff]   ;;  %v3002_v6 = vmov 0.0|0.0  }
  0x58   :  { %v2463_v36 = vld [vmem:[#allocation10] ss:$16 sps:$4 sm:$0xff]   ;;  %v2469_v38 = vld [vmem:[#allocation10 + $0x24] ss:$16 sps:$4 sm:$0xff]   ;;  %v2477_v41 = vld [vmem:[#allocation10 + $0x28] ss:$16 sps:$4 sm:$0xff]  }
  0x59   :  { %v2473_v40 = vld [vmem:[#allocation10 + $0x20] ss:$16 sps:$4 sm:$0xff]   ;;  %v2481_v42 = vld [vmem:[#allocation10 + $0x44] ss:$16 sps:$4 sm:$0xff]   ;;  %v2483_v43 = vld [vmem:[#allocation10 + $0x4c] ss:$16 sps:$4 sm:$0xff]  }
  0x5a   :  { %339 = vmatpush1.bf16.msra.mxu0 %v1986_v15  ;;  %412 = vmatpush1.bf16.msra.mxu1 %v1987_v16  ;;  %v2487_v45 = vld [vmem:[#allocation10 + $0x40] ss:$16 sps:$4 sm:$0xff]   ;;  %v2489_v46 = vld [vmem:[#allocation10 + $0x48] ss:$16 sps:$4 sm:$0xff]   ;;  %v2493_v47 = vld [vmem:[#allocation10 + $0x64] ss:$16 sps:$4 sm:$0xff]  }
  0x5b   :  { %340 = vmatprep.subr.bf16.mxu0 %v1988_v17  ;;  %413 = vmatprep.subr.bf16.mxu1 %v1990_v18  ;;  %v2497_v48 = vld [vmem:[#allocation10 + $0x6c] ss:$16 sps:$4 sm:$0xff]   ;;  %v2499_v49 = vld [vmem:[#allocation10 + $0x60] ss:$16 sps:$4 sm:$0xff]   ;;  %v2501_v50 = vld [vmem:[#allocation10 + $0x68] ss:$16 sps:$4 sm:$0xff]  }
  0x5c   :  { %v2505_v51 = vld [vmem:[#allocation10 + $0x84] ss:$16 sps:$4 sm:$0xff]   ;;  %v2509_v52 = vld [vmem:[#allocation10 + $0x8c] ss:$16 sps:$4 sm:$0xff]   ;;  %v2515_v54 = vld [vmem:[#allocation10 + $0x80] ss:$16 sps:$4 sm:$0xff]  }
  0x5d   :  { %v2038_v53 = vld [vmem:[#allocation5 + $0x10] sm:$0xff]   ;;  %v2517_v55 = vld [vmem:[#allocation10 + $0x88] ss:$16 sps:$4 sm:$0xff]   ;;  %v2523_v57 = vld [vmem:[#allocation10 + $0xac] ss:$16 sps:$4 sm:$0xff]   ;;  %v129_v8 = vshrl.u32 %v128_v7, 7 }
  0x5e   :  { %341 = vmatpush1.bf16.msra.mxu0 %v1992_v19  ;;  %414 = vmatpush1.bf16.msra.mxu1 %v1993_v20  ;;  %v2521_v56 = vld [vmem:[#allocation10 + $0xa4] ss:$16 sps:$4 sm:$0xff]   ;;  %v2527_v58 = vld [vmem:[#allocation10 + $0xa0] ss:$16 sps:$4 sm:$0xff]   ;;  %v2529_v59 = vld [vmem:[#allocation10 + $0xa8] ss:$16 sps:$4 sm:$0xff]  }
  0x5f   :  { %342 = vmatprep.subr.bf16.mxu0 %v1994_v21  ;;  %415 = vmatprep.subr.bf16.mxu1 %v1996_v22  ;;  %v2533_v60 = vld [vmem:[#allocation10 + $0xc4] ss:$16 sps:$4 sm:$0xff]   ;;  %v2535_v61 = vld [vmem:[#allocation10 + $0xcc] ss:$16 sps:$4 sm:$0xff]   ;;  %v2541_v63 = vld [vmem:[#allocation10 + $0xc0] ss:$16 sps:$4 sm:$0xff]  }
  0x60   :  { %v2051_v62 = vld [vmem:[#allocation5 + $0x18] sm:$0xff]   ;;  %v2547_v2 = vld [vmem:[#allocation10 + $0xe4] ss:$16 sps:$4 sm:$0xff]   ;;  %v2553_v4 = vld [vmem:[#allocation10 + $0xe0] ss:$16 sps:$4 sm:$0xff]   ;;  %v138_v9 = vsub.s32 2, %v129_v8 }
  0x61   :  { %v2543_v1 = vld [vmem:[#allocation10 + $0xc8] ss:$16 sps:$4 sm:$0xff]   ;;  %v2549_v3 = vld [vmem:[#allocation10 + $0xec] ss:$16 sps:$4 sm:$0xff]   ;;  %v142_v10 = vsub.s32 3, %v129_v8  ;;  %v130_v11 = vsub.s32 0, %v129_v8 }
  0x62   :  { %343 = vmatpush1.bf16.msra.mxu0 %v1998_v23  ;;  %416 = vmatpush1.bf16.msra.mxu1 %v1999_v24  ;;  %v2555_v5 = vld [vmem:[#allocation10 + $0xe8] ss:$16 sps:$4 sm:$0xff]   ;;  %v126_v12 = vld [vmem:[%s2998_s3] sm:$0xf]  ;;  %v134_v13 = vsub.s32 1, %v129_v8  ;;  %vm2358_vm0 = vmmov 0  }
  0x63   :  { %344 = vmatprep.subr.bf16.mxu0 %v2000_v25  ;;  %417 = vmatprep.subr.bf16.mxu1 %v2002_v26  ;;  %v2604_v14 = vrot.slane %v126_v12, %v138_v9  ;;  %v2610_v17 = vrot.slane %v126_v12, %v142_v10  ;;  %v131_v18 = vrot.slane %v126_v12, %v130_v11  ;;  %s2360_s25 = smov [#allocation13]  }
  0x64   :  { %v135_v21 = vrot.slane %v126_v12, %v134_v13  ;;  %s1762_s26 = sshll.u32 %s2360_s25, 4  ;;  %s1763_s26 = int_to_ptr.vmem [resolvable:$true] %s1762_s26 }
  0x65   :  { %s2316_s27 = scalar_lea.vmem %s1763_s26, 128  ;;  %p2321_p5 = scmp.lt.s32.totalorder %s1763_s26, %s1763_s26 }
  0x66   :  { %345 = vmatpush1.bf16.msra.mxu0 %v2004_v27  ;;  %418 = vmatpush1.bf16.msra.mxu1 %v2005_v28  ;;  %p2317_p4 = scmp.ne.s32.totalorder %s1763_s26, %s2316_s27  ;;  %p2322_p6 = scmp.lt.s32.totalorder %s2316_s27, %s2316_s27 }
  0x67   :  { %346 = vmatprep.subr.bf16.mxu0 %v2006_v29  ;;  %419 = vmatprep.subr.bf16.mxu1 %v2008_v30 }
  0x68   :  { %p2323_p7 = por %p2322_p6, %p2321_p5 }
  0x6a   :  { %347 = vmatpush1.bf16.msra.mxu0 %v2010_v31  ;;  %420 = vmatpush1.bf16.msra.mxu1 %v2011_v32  ;;  %p2324_p8 = pnand %p2323_p7, %p2317_p4 }
  0x6b   :  { %712 = vmatprep.subr.bf16.mxu0 %v2459_v33  ;;  %753 = vmatprep.subr.bf16.mxu1 %v2461_v34 }
  0x6d   :  { %365 = vmatmul.mubr.bf16.vlgmr.msra.gmra.mrb[0].mxu0 %v2012_v35  ;;  %438 = vmatmul.mubr.bf16.vlgmr.msra.gmra.mrb[0].mxu1 %v2012_v35 }
  0x6e   :  { %713 = vmatpush1.bf16.msra.mxu0 %v2463_v36  ;;  %754 = vmatpush1.bf16.msra.mxu1 %v2465_v37 }
  0x6f   :  { %714 = vmatprep.subr.bf16.mxu0 %v2469_v38  ;;  %755 = vmatprep.subr.bf16.mxu1 %v2471_v39 }
  0x70   :  { %374 = vmatprep.mubr.bf16.mxu0 %v3004_v0  ;;  %447 = vmatprep.mubr.bf16.mxu1 %v3004_v0 }
  0x72   :  { %715 = vmatpush1.bf16.msra.mxu0 %v2473_v40  ;;  %756 = vmatpush1.bf16.msra.mxu1 %v2477_v41 }
  0x73   :  { %716 = vmatprep.subr.bf16.mxu0 %v2481_v42  ;;  %757 = vmatprep.subr.bf16.mxu1 %v2483_v43 }
  0x75   :  { %375 = vmatmul.mubr.bf16.gmra.mrb[4].mxu0 %v2025_v44  ;;  %448 = vmatmul.mubr.bf16.gmra.mrb[4].mxu1 %v2025_v44 }
  0x76   :  { %717 = vmatpush1.bf16.msra.mxu0 %v2487_v45  ;;  %758 = vmatpush1.bf16.msra.mxu1 %v2489_v46 }
  0x77   :  { %718 = vmatprep.subr.bf16.mxu0 %v2493_v47  ;;  %759 = vmatprep.subr.bf16.mxu1 %v2497_v48 }
  0x78   :  { %384 = vmatprep.mubr.bf16.mxu0 %v3004_v0  ;;  %457 = vmatprep.mubr.bf16.mxu1 %v3004_v0 }
  0x7a   :  { %719 = vmatpush1.bf16.msra.mxu0 %v2499_v49  ;;  %760 = vmatpush1.bf16.msra.mxu1 %v2501_v50 }
  0x7b   :  { %720 = vmatprep.subr.bf16.mxu0 %v2505_v51  ;;  %761 = vmatprep.subr.bf16.mxu1 %v2509_v52 }
  0x7d   :  { %385 = vmatmul.mubr.bf16.gmra.mrb[8].mxu0 %v2038_v53  ;;  %458 = vmatmul.mubr.bf16.gmra.mrb[8].mxu1 %v2038_v53 }
  0x7e   :  { %721 = vmatpush1.bf16.msra.mxu0 %v2515_v54  ;;  %762 = vmatpush1.bf16.msra.mxu1 %v2517_v55 }
  0x7f   :  { %722 = vmatprep.subr.bf16.mxu0 %v2521_v56  ;;  %763 = vmatprep.subr.bf16.mxu1 %v2523_v57 }
  0x80   :  { %394 = vmatprep.mubr.bf16.mxu0 %v3004_v0  ;;  %467 = vmatprep.mubr.bf16.mxu1 %v3004_v0 }
  0x82   :  { %723 = vmatpush1.bf16.msra.mxu0 %v2527_v58  ;;  %764 = vmatpush1.bf16.msra.mxu1 %v2529_v59 }
  0x83   :  { %724 = vmatprep.subr.bf16.mxu0 %v2533_v60  ;;  %765 = vmatprep.subr.bf16.mxu1 %v2535_v61 }
  0x85   :  { %395 = vmatmul.mubr.bf16.gmra.mrb[12].mxu0 %v2051_v62  ;;  %468 = vmatmul.mubr.bf16.gmra.mrb[12].mxu1 %v2051_v62 }
  0x86   :  { %725 = vmatpush1.bf16.msra.mxu0 %v2541_v63  ;;  %766 = vmatpush1.bf16.msra.mxu1 %v2543_v1 }
  0x87   :  { %726 = vmatprep.subr.bf16.mxu0 %v2547_v2  ;;  %767 = vmatprep.subr.bf16.mxu1 %v2549_v3 }
  0x88   :  { %744 = vmatprep.mubr.bf16.mxu0 %v3004_v0  ;;  %785 = vmatprep.mubr.bf16.mxu1 %v3004_v0 }
  0x8a   :  { %727 = vmatpush1.bf16.msra.mxu0 %v2553_v4  ;;  %768 = vmatpush1.bf16.msra.mxu1 %v2555_v5 }
  0x8b   :  { %830 = vmatprep.subr.bf16.mxu0 %v2459_v33  ;;  %871 = vmatprep.subr.bf16.mxu1 %v2461_v34 }
  0x8d   :  { %745 = vmatmul.mubr.bf16.vlgmr.msra.gmra.mrb[16].mxu0 %v3002_v6  ;;  %786 = vmatmul.mubr.bf16.vlgmr.msra.gmra.mrb[16].mxu1 %v3002_v6 }
  0x8e   :  { %831 = vmatpush1.bf16.msra.mxu0 %v2463_v36  ;;  %872 = vmatpush1.bf16.msra.mxu1 %v2465_v37 }
  0x8f   :  { %832 = vmatprep.subr.bf16.mxu0 %v2469_v38  ;;  %873 = vmatprep.subr.bf16.mxu1 %v2471_v39 }
  0x90   :  { %862 = vmatprep.mubr.bf16.mxu0 %v3004_v0  ;;  %903 = vmatprep.mubr.bf16.mxu1 %v3004_v0 }
  0x92   :  { %833 = vmatpush1.bf16.msra.mxu0 %v2473_v40  ;;  %874 = vmatpush1.bf16.msra.mxu1 %v2477_v41 }
  0x93   :  { %834 = vmatprep.subr.bf16.mxu0 %v2481_v42  ;;  %875 = vmatprep.subr.bf16.mxu1 %v2483_v43 }
  0x96   :  { %835 = vmatpush1.bf16.msra.mxu0 %v2487_v45  ;;  %876 = vmatpush1.bf16.msra.mxu1 %v2489_v46 }
  0x97   :  { %836 = vmatprep.subr.bf16.mxu0 %v2493_v47  ;;  %877 = vmatprep.subr.bf16.mxu1 %v2497_v48 }
  0x9a   :  { %837 = vmatpush1.bf16.msra.mxu0 %v2499_v49  ;;  %878 = vmatpush1.bf16.msra.mxu1 %v2501_v50 }
  0x9b   :  { %838 = vmatprep.subr.bf16.mxu0 %v2505_v51  ;;  %879 = vmatprep.subr.bf16.mxu1 %v2509_v52 }
  0x9e   :  { %839 = vmatpush1.bf16.msra.mxu0 %v2515_v54  ;;  %880 = vmatpush1.bf16.msra.mxu1 %v2517_v55 }
  0x9f   :  { %840 = vmatprep.subr.bf16.mxu0 %v2521_v56  ;;  %881 = vmatprep.subr.bf16.mxu1 %v2523_v57 }
  0xa2   :  { %841 = vmatpush1.bf16.msra.mxu0 %v2527_v58  ;;  %882 = vmatpush1.bf16.msra.mxu1 %v2529_v59 }
  0xa3   :  { %842 = vmatprep.subr.bf16.mxu0 %v2533_v60  ;;  %883 = vmatprep.subr.bf16.mxu1 %v2535_v61 }
  0xa6   :  { %843 = vmatpush1.bf16.msra.mxu0 %v2541_v63  ;;  %884 = vmatpush1.bf16.msra.mxu1 %v2543_v1 }
  0xa7   :  { %844 = vmatprep.subr.bf16.mxu0 %v2547_v2  ;;  %885 = vmatprep.subr.bf16.mxu1 %v2549_v3 }
  0xaa   :  { %845 = vmatpush1.bf16.msra.mxu0 %v2553_v4  ;;  %886 = vmatpush1.bf16.msra.mxu1 %v2555_v5 }
  0xab   :  { %948 = vmatprep.subr.bf16.mxu0 %v2459_v33  ;;  %989 = vmatprep.subr.bf16.mxu1 %v2461_v34 }
 0x140   :  { %v2606_v15 = vpop.f32.mrb[0].mxu0  ;;  %v2608_v16 = vpop.f32.mrb[0].mxu1 }
 0x141   :  { %v368_v19 = vpop.f32.mrb[1].mxu0  ;;  %v441_v20 = vpop.f32.mrb[1].mxu1 }
 0x142   :  { %v370_v22 = vpop.f32.mrb[2].mxu0  ;;  %v443_v23 = vpop.f32.mrb[2].mxu1 }
 0x143   :  { %v2612_v24 = vadd.f32 %v370_v22, %v131_v18  ;;  %v372_v25 = vpop.f32.mrb[3].mxu0  ;;  %v2615_v26 = vadd.f32 %v443_v23, %v2604_v14  ;;  %v445_v27 = vpop.f32.mrb[3].mxu1 }
 0x144   :  { %v2617_v28 = vadd.f32 %v372_v25, %v135_v21  ;;  %v2620_v29 = vadd.f32 %v445_v27, %v2610_v17 }
 0x148   :  { %v376_v30 = vpop.f32.mrb[4].mxu0  ;;  %v449_v31 = vpop.f32.mrb[4].mxu1 }
 0x149   :  { %v2622_v32 = vadd.f32 %v376_v30, %v131_v18  ;;  %v378_v35 = vpop.f32.mrb[5].mxu0  ;;  %v2625_v44 = vadd.f32 %v449_v31, %v2604_v14  ;;  %v451_v53 = vpop.f32.mrb[5].mxu1 }
 0x14a   :  { %v2627_v62 = vadd.f32 %v378_v35, %v135_v21  ;;  %v380_v7 = vpop.f32.mrb[6].mxu0  ;;  %v2630_v8 = vadd.f32 %v451_v53, %v2610_v17  ;;  %v453_v9 = vpop.f32.mrb[6].mxu1 }
 0x14b   :  { %v2632_v10 = vadd.f32 %v380_v7, %v131_v18  ;;  %v382_v11 = vpop.f32.mrb[7].mxu0  ;;  %v2635_v12 = vadd.f32 %v453_v9, %v2604_v14  ;;  %v455_v13 = vpop.f32.mrb[7].mxu1 }
 0x14c   :  { %3006 = vst [vmem:[#allocation18_spill] sm:$0xff] %v2630_v8  ;;  %v2637_v22 = vadd.f32 %v382_v11, %v135_v21  ;;  %v2640_v23 = vadd.f32 %v455_v13, %v2610_v17 }
 0x14d   :  { %3007 = vst [vmem:[#allocation19_spill] sm:$0xff] %v2632_v10  ;;  %3008 = vst [vmem:[#allocation20_spill] sm:$0xff] %v2635_v12 }
 0x14e   :  { %3009 = vst [vmem:[#allocation21_spill] sm:$0xff] %v2637_v22  ;;  %3010 = vst [vmem:[#allocation22_spill] sm:$0xff] %v2640_v23 }
 0x150   :  { %v386_v25 = vpop.f32.mrb[8].mxu0  ;;  %v459_v27 = vpop.f32.mrb[8].mxu1 }
 0x151   :  { %v2642_v30 = vadd.f32 %v386_v25, %v131_v18  ;;  %v388_v31 = vpop.f32.mrb[9].mxu0  ;;  %v2645_v35 = vadd.f32 %v459_v27, %v2604_v14  ;;  %v461_v53 = vpop.f32.mrb[9].mxu1 }
 0x152   :  { %v2647_v7 = vadd.f32 %v388_v31, %v135_v21  ;;  %v390_v6 = vpop.f32.mrb[10].mxu0  ;;  %v2650_v9 = vadd.f32 %v461_v53, %v2610_v17  ;;  %v463_v11 = vpop.f32.mrb[10].mxu1 }
 0x153   :  { %3011 = vst [vmem:[#allocation23_spill] sm:$0xff] %v2642_v30  ;;  %3012 = vst [vmem:[#allocation24_spill] sm:$0xff] %v2645_v35  ;;  %v2652_v0 = vadd.f32 %v390_v6, %v131_v18  ;;  %v392_v13 = vpop.f32.mrb[11].mxu0  ;;  %v2655_v23 = vadd.f32 %v463_v11, %v2604_v14  ;;  %v465_v25 = vpop.f32.mrb[11].mxu1 }
 0x154   :  { %3013 = vst [vmem:[#allocation25_spill] sm:$0xff] %v2647_v7  ;;  %3014 = vst [vmem:[#allocation26_spill] sm:$0xff] %v2650_v9  ;;  %v2657_v30 = vadd.f32 %v392_v13, %v135_v21  ;;  %v2660_v27 = vadd.f32 %v465_v25, %v2610_v17 }
 0x155   :  { %3015 = vst [vmem:[#allocation27_spill] sm:$0xff] %v2652_v0  ;;  %3016 = vst [vmem:[#allocation28_spill] sm:$0xff] %v2655_v23 }
 0x156   :  { %3017 = vst [vmem:[#allocation29_spill] sm:$0xff] %v2657_v30  ;;  %3018 = vst [vmem:[#allocation30_spill] sm:$0xff] %v2660_v27 }
 0x158   :  { %v396_v35 = vpop.f32.mrb[12].mxu0  ;;  %v469_v31 = vpop.f32.mrb[12].mxu1 }
 0x159   :  { %v2662_v7 = vadd.f32 %v396_v35, %v131_v18  ;;  %v398_v22 = vpop.f32.mrb[13].mxu0  ;;  %v2665_v53 = vadd.f32 %v469_v31, %v2604_v14  ;;  %v471_v6 = vpop.f32.mrb[13].mxu1 }
 0x15a   :  { %v2667_v0 = vadd.f32 %v398_v22, %v135_v21  ;;  %v400_v9 = vpop.f32.mrb[14].mxu0  ;;  %v2670_v11 = vadd.f32 %v471_v6, %v2610_v17  ;;  %v473_v13 = vpop.f32.mrb[14].mxu1  ;;  %v367_v22 = vadd.f32 %v2606_v15, %v131_v18  ;;  %v369_v6 = vadd.f32 %v368_v19, %v135_v21 }
 0x15b   :  { %3019 = vst [vmem:[#allocation31_spill] sm:$0xff] %v2662_v7  ;;  %3020 = vst [vmem:[#allocation32_spill] sm:$0xff] %v2665_v53  ;;  %v2672_v30 = vadd.f32 %v400_v9, %v131_v18  ;;  %v402_v25 = vpop.f32.mrb[15].mxu0  ;;  %v2675_v27 = vadd.f32 %v473_v13, %v2604_v14  ;;  %v475_v35 = vpop.f32.mrb[15].mxu1 }
 0x15c   :  { %3021 = vst [vmem:[#allocation33_spill] sm:$0xff] %v2667_v0  ;;  %3022 = vst [vmem:[#allocation34_spill] sm:$0xff] %v2670_v11  ;;  %v2677_v7 = vadd.f32 %v402_v25, %v135_v21  ;;  %v2680_v31 = vadd.f32 %v475_v35, %v2610_v17  ;;  %v440_v0 = vadd.f32 %v2608_v16, %v2604_v14 }
 0x15d   :  { %3023 = vst [vmem:[#allocation35_spill] sm:$0xff] %v2672_v30  ;;  %3024 = vst [vmem:[#allocation36_spill] sm:$0xff] %v2675_v27  ;;  %v442_v11 = vadd.f32 %v441_v20, %v2610_v17 }
 0x15e   :  { %3025 = vst [vmem:[#allocation37_spill] sm:$0xff] %v2677_v7  ;;  %3026 = vst [vmem:[#allocation38_spill] sm:$0xff] %v2680_v31 }
 0x160   :  { %v746_v9 = vpop.f32.mrb[16].mxu0  ;;  %v787_v30 = vpop.f32.mrb[16].mxu1 }
 0x161   :  { %v794_v53 = vadd.f32 %v746_v9, %v367_v22  ;;  %v796_v23 = vadd.f32 %v787_v30, %v440_v0  ;;  %v748_v13 = vpop.f32.mrb[17].mxu0  ;;  %v789_v27 = vpop.f32.mrb[17].mxu1 }
 0x162   :  { %v795_v12 = vadd.f32 %v748_v13, %v369_v6  ;;  %v797_v25 = vadd.f32 %v789_v27, %v442_v11  ;;  %v750_v7 = vpop.f32.mrb[18].mxu0  ;;  %v791_v10 = vpop.f32.mrb[18].mxu1 }
 0x163   :  { %v1848_v35 = vmul.f32 -1.442695, %v794_v53  ;;  %v751_v31 = vpop.f32.mrb[19].mxu0  ;;  %v792_v8 = vpop.f32.mrb[19].mxu1 }
 0x164   :  { %v1849_v15 = vmul.f32 -1.442695, %v795_v12  ;;  %v1850_v14 = vmul.f32 -1.442695, %v797_v25 }
 0x165   :  { %2064 = vpow2.f32 %v1848_v35 }
 0x166   :  { %2066 = vpow2.f32 %v1849_v15 }
 0x167   :  { %2068 = vpow2.f32 %v1850_v14 }
 0x168   :  { %2070 = vtanh.f32 %v796_v23  ;;  %v3027_v23 = vmov 0  }
 0x16f   :  { %v2065_v16 = vpop.eup %2064 }
 0x170   :  { %v2067_v18 = vpop.eup %2066  ;;  %v801_v17 = vadd.f32 1.0, %v2065_v16 }
 0x171   :  { %v807_v19 = vadd.f32 1.0, %v2067_v18  ;;  %v2069_v0 = vpop.eup %2068 }
 0x172   :  { %2072 = vrcp.f32 %v801_v17  ;;  %v2071_v20 = vpop.eup %2070  ;;  %v814_v7 = vadd.f32 1.0, %v2069_v0 }
 0x173   :  { %2074 = vrcp.f32 %v807_v19 }
 0x174   :  { %2076 = vrcp.f32 %v814_v7 }
 0x17c   :  { %v2073_v21 = vpop.eup %2072 }
 0x17d   :  { %v2075_v30 = vpop.eup %2074  ;;  %v818_v10 = vmul.f32 %v2073_v21, %v2071_v20 }
 0x17e   :  { %v817_v27 = vmul.f32 0.0, %v2075_v30  ;;  %v2077_v12 = vpop.eup %2076 }
 0x180   :  { %v2686_v8 = vadd.f32 %v818_v10, %v817_v27 }
 0x182   :  { %2078 = vtanh.f32 %v2686_v8 }
 0x18c   :  { %v2079_v53 = vpop.eup %2078 }
 0x18d   :  { %v821_v11 = vmul.f32 %v2079_v53, %v2077_v12 }
 0x18f   :  { %v829_v31 = vpack.c.bf16 %v821_v11, %v821_v11 }
 0x191   :  { %863 = vmatmul.mubr.bf16.vlgmr.msra.gmra.mrb[20].mxu0 %v829_v31  ;;  %904 = vmatmul.mubr.bf16.vlgmr.msra.gmra.mrb[20].mxu1 %v829_v31 }
 0x192   :  { %949 = vmatpush1.bf16.msra.mxu0 %v2463_v36  ;;  %990 = vmatpush1.bf16.msra.mxu1 %v2465_v37 }
 0x193   :  { %950 = vmatprep.subr.bf16.mxu0 %v2469_v38  ;;  %991 = vmatprep.subr.bf16.mxu1 %v2471_v39 }
 0x194   :  { %980 = vmatprep.mubr.bf16.mxu0 %v3027_v23  ;;  %1021 = vmatprep.mubr.bf16.mxu1 %v3027_v23 }
 0x196   :  { %951 = vmatpush1.bf16.msra.mxu0 %v2473_v40  ;;  %992 = vmatpush1.bf16.msra.mxu1 %v2477_v41 }
 0x197   :  { %952 = vmatprep.subr.bf16.mxu0 %v2481_v42  ;;  %993 = vmatprep.subr.bf16.mxu1 %v2483_v43 }
 0x19a   :  { %953 = vmatpush1.bf16.msra.mxu0 %v2487_v45  ;;  %994 = vmatpush1.bf16.msra.mxu1 %v2489_v46 }
 0x19b   :  { %954 = vmatprep.subr.bf16.mxu0 %v2493_v47  ;;  %995 = vmatprep.subr.bf16.mxu1 %v2497_v48 }
 0x19e   :  { %955 = vmatpush1.bf16.msra.mxu0 %v2499_v49  ;;  %996 = vmatpush1.bf16.msra.mxu1 %v2501_v50 }
 0x19f   :  { %956 = vmatprep.subr.bf16.mxu0 %v2505_v51  ;;  %997 = vmatprep.subr.bf16.mxu1 %v2509_v52 }
 0x1a2   :  { %957 = vmatpush1.bf16.msra.mxu0 %v2515_v54  ;;  %998 = vmatpush1.bf16.msra.mxu1 %v2517_v55 }
 0x1a3   :  { %958 = vmatprep.subr.bf16.mxu0 %v2521_v56  ;;  %999 = vmatprep.subr.bf16.mxu1 %v2523_v57 }
 0x1a6   :  { %959 = vmatpush1.bf16.msra.mxu0 %v2527_v58  ;;  %1000 = vmatpush1.bf16.msra.mxu1 %v2529_v59 }
 0x1a7   :  { %960 = vmatprep.subr.bf16.mxu0 %v2533_v60  ;;  %1001 = vmatprep.subr.bf16.mxu1 %v2535_v61 }
 0x1aa   :  { %961 = vmatpush1.bf16.msra.mxu0 %v2541_v63  ;;  %1002 = vmatpush1.bf16.msra.mxu1 %v2543_v1 }
 0x1ab   :  { %962 = vmatprep.subr.bf16.mxu0 %v2547_v2  ;;  %1003 = vmatprep.subr.bf16.mxu1 %v2549_v3 }
 0x1ae   :  { %963 = vmatpush1.bf16.msra.mxu0 %v2553_v4  ;;  %1004 = vmatpush1.bf16.msra.mxu1 %v2555_v5 }
 0x1af   :  { %1066 = vmatprep.subr.bf16.mxu0 %v2459_v33  ;;  %1107 = vmatprep.subr.bf16.mxu1 %v2461_v34 }
 0x264   :  { %v864_v22 = vpop.f32.mrb[20].mxu0  ;;  %v905_v6 = vpop.f32.mrb[20].mxu1 }
 0x265   :  { %v912_v9 = vadd.f32 %v864_v22, %v2612_v24  ;;  %v914_v13 = vadd.f32 %v905_v6, %v2615_v26  ;;  %v866_v25 = vpop.f32.mrb[21].mxu0  ;;  %v907_v35 = vpop.f32.mrb[21].mxu1 }
 0x266   :  { %v913_v15 = vadd.f32 %v866_v25, %v2617_v28  ;;  %v915_v14 = vadd.f32 %v907_v35, %v2620_v29  ;;  %v868_v16 = vpop.f32.mrb[22].mxu0  ;;  %v909_v18 = vpop.f32.mrb[22].mxu1 }
 0x267   :  { %v1851_v17 = vmul.f32 -1.442695, %v912_v9  ;;  %v869_v19 = vpop.f32.mrb[23].mxu0  ;;  %v910_v0 = vpop.f32.mrb[23].mxu1 }
 0x268   :  { %v1852_v20 = vmul.f32 -1.442695, %v913_v15  ;;  %v1853_v21 = vmul.f32 -1.442695, %v915_v14 }
 0x269   :  { %2080 = vpow2.f32 %v1851_v17  ;;  %v3028_v17 = vld [vmem:[#allocation18_spill] sm:$0xff] }
 0x26a   :  { %2082 = vpow2.f32 %v1852_v20 }
 0x26b   :  { %2084 = vpow2.f32 %v1853_v21 }
 0x26c   :  { %2086 = vtanh.f32 %v914_v13 }
 0x273   :  { %v2081_v30 = vpop.eup %2080 }
 0x274   :  { %v2083_v10 = vpop.eup %2082  ;;  %v919_v24 = vadd.f32 1.0, %v2081_v30 }
 0x275   :  { %v925_v26 = vadd.f32 1.0, %v2083_v10  ;;  %v2085_v28 = vpop.eup %2084 }
 0x276   :  { %2088 = vrcp.f32 %v919_v24  ;;  %v2087_v7 = vpop.eup %2086  ;;  %v932_v53 = vadd.f32 1.0, %v2085_v28 }
 0x277   :  { %2090 = vrcp.f32 %v925_v26 }
 0x278   :  { %2092 = vrcp.f32 %v932_v53 }
 0x280   :  { %v2089_v29 = vpop.eup %2088 }
 0x281   :  { %v2091_v27 = vpop.eup %2090  ;;  %v936_v12 = vmul.f32 %v2089_v29, %v2087_v7 }
 0x282   :  { %v935_v11 = vmul.f32 %v2091_v27, %v2686_v8  ;;  %v2093_v22 = vpop.eup %2092 }
 0x284   :  { %v2728_v31 = vadd.f32 %v936_v12, %v935_v11 }
 0x286   :  { %2094 = vtanh.f32 %v2728_v31 }
 0x290   :  { %v2095_v6 = vpop.eup %2094 }
 0x291   :  { %v939_v9 = vmul.f32 %v2095_v6, %v2093_v22 }
 0x293   :  { %v947_v13 = vpack.c.bf16 %v939_v9, %v939_v9 }
 0x295   :  { %981 = vmatmul.mubr.bf16.vlgmr.msra.gmra.mrb[24].mxu0 %v947_v13  ;;  %1022 = vmatmul.mubr.bf16.vlgmr.msra.gmra.mrb[24].mxu1 %v947_v13 }
 0x296   :  { %1067 = vmatpush1.bf16.msra.mxu0 %v2463_v36  ;;  %1108 = vmatpush1.bf16.msra.mxu1 %v2465_v37 }
 0x297   :  { %1068 = vmatprep.subr.bf16.mxu0 %v2469_v38  ;;  %1109 = vmatprep.subr.bf16.mxu1 %v2471_v39 }
 0x298   :  { %1098 = vmatprep.mubr.bf16.mxu0 %v3027_v23  ;;  %1139 = vmatprep.mubr.bf16.mxu1 %v3027_v23 }
 0x29a   :  { %1069 = vmatpush1.bf16.msra.mxu0 %v2473_v40  ;;  %1110 = vmatpush1.bf16.msra.mxu1 %v2477_v41 }
 0x29b   :  { %1070 = vmatprep.subr.bf16.mxu0 %v2481_v42  ;;  %1111 = vmatprep.subr.bf16.mxu1 %v2483_v43 }
 0x29e   :  { %1071 = vmatpush1.bf16.msra.mxu0 %v2487_v45  ;;  %1112 = vmatpush1.bf16.msra.mxu1 %v2489_v46 }
 0x29f   :  { %1072 = vmatprep.subr.bf16.mxu0 %v2493_v47  ;;  %1113 = vmatprep.subr.bf16.mxu1 %v2497_v48 }
 0x2a2   :  { %1073 = vmatpush1.bf16.msra.mxu0 %v2499_v49  ;;  %1114 = vmatpush1.bf16.msra.mxu1 %v2501_v50 }
 0x2a3   :  { %1074 = vmatprep.subr.bf16.mxu0 %v2505_v51  ;;  %1115 = vmatprep.subr.bf16.mxu1 %v2509_v52 }
 0x2a6   :  { %1075 = vmatpush1.bf16.msra.mxu0 %v2515_v54  ;;  %1116 = vmatpush1.bf16.msra.mxu1 %v2517_v55 }
 0x2a7   :  { %1076 = vmatprep.subr.bf16.mxu0 %v2521_v56  ;;  %1117 = vmatprep.subr.bf16.mxu1 %v2523_v57 }
 0x2aa   :  { %1077 = vmatpush1.bf16.msra.mxu0 %v2527_v58  ;;  %1118 = vmatpush1.bf16.msra.mxu1 %v2529_v59 }
 0x2ab   :  { %1078 = vmatprep.subr.bf16.mxu0 %v2533_v60  ;;  %1119 = vmatprep.subr.bf16.mxu1 %v2535_v61 }
 0x2ae   :  { %1079 = vmatpush1.bf16.msra.mxu0 %v2541_v63  ;;  %1120 = vmatpush1.bf16.msra.mxu1 %v2543_v1 }
 0x2af   :  { %1080 = vmatprep.subr.bf16.mxu0 %v2547_v2  ;;  %1121 = vmatprep.subr.bf16.mxu1 %v2549_v3 }
 0x2b2   :  { %1081 = vmatpush1.bf16.msra.mxu0 %v2553_v4  ;;  %1122 = vmatpush1.bf16.msra.mxu1 %v2555_v5 }
 0x2b3   :  { %1184 = vmatprep.subr.bf16.mxu0 %v2459_v33  ;;  %1225 = vmatprep.subr.bf16.mxu1 %v2461_v34 }
 0x368   :  { %v982_v8 = vpop.f32.mrb[24].mxu0  ;;  %v1023_v25 = vpop.f32.mrb[24].mxu1 }
 0x369   :  { %v1030_v35 = vadd.f32 %v982_v8, %v2622_v32  ;;  %v1032_v15 = vadd.f32 %v1023_v25, %v2625_v44  ;;  %v984_v14 = vpop.f32.mrb[25].mxu0  ;;  %v1025_v16 = vpop.f32.mrb[25].mxu1 }
 0x36a   :  { %v1031_v18 = vadd.f32 %v984_v14, %v2627_v62  ;;  %v1033_v19 = vadd.f32 %v1025_v16, %v3028_v17  ;;  %v986_v0 = vpop.f32.mrb[26].mxu0  ;;  %v1027_v20 = vpop.f32.mrb[26].mxu1  ;;  %v3030_v16 = vld [vmem:[#allocation20_spill] sm:$0xff] }
 0x36b   :  { %v1854_v21 = vmul.f32 -1.442695, %v1030_v35  ;;  %v987_v30 = vpop.f32.mrb[27].mxu0  ;;  %v1028_v10 = vpop.f32.mrb[27].mxu1  ;;  %v3031_v0 = vld [vmem:[#allocation21_spill] sm:$0xff] }
 0x36c   :  { %v1855_v24 = vmul.f32 -1.442695, %v1031_v18  ;;  %v1856_v26 = vmul.f32 -1.442695, %v1033_v19 }
 0x36d   :  { %2096 = vpow2.f32 %v1854_v21  ;;  %v3032_v21 = vld [vmem:[#allocation22_spill] sm:$0xff] }
 0x36e   :  { %2098 = vpow2.f32 %v1855_v24 }
 0x36f   :  { %2100 = vpow2.f32 %v1856_v26 }
 0x370   :  { %2102 = vtanh.f32 %v1032_v15  ;;  %v3029_v15 = vld [vmem:[#allocation19_spill] sm:$0xff] }
 0x377   :  { %v2097_v28 = vpop.eup %2096 }
 0x378   :  { %v2099_v7 = vpop.eup %2098  ;;  %v1037_v32 = vadd.f32 1.0, %v2097_v28 }
 0x379   :  { %v1043_v44 = vadd.f32 1.0, %v2099_v7  ;;  %v2101_v62 = vpop.eup %2100 }
 0x37a   :  { %2104 = vrcp.f32 %v1037_v32  ;;  %v2103_v29 = vpop.eup %2102  ;;  %v1050_v11 = vadd.f32 1.0, %v2101_v62 }
 0x37b   :  { %2106 = vrcp.f32 %v1043_v44 }
 0x37c   :  { %2108 = vrcp.f32 %v1050_v11 }
 0x384   :  { %v2105_v27 = vpop.eup %2104 }
 0x385   :  { %v2107_v12 = vpop.eup %2106  ;;  %v1054_v53 = vmul.f32 %v2105_v27, %v2103_v29 }
 0x386   :  { %v1053_v22 = vmul.f32 %v2107_v12, %v2728_v31  ;;  %v2109_v9 = vpop.eup %2108 }
 0x388   :  { %v2770_v6 = vadd.f32 %v1054_v53, %v1053_v22 }
 0x38a   :  { %2110 = vtanh.f32 %v2770_v6 }
 0x394   :  { %v2111_v13 = vpop.eup %2110 }
 0x395   :  { %v1057_v8 = vmul.f32 %v2111_v13, %v2109_v9 }
 0x397   :  { %v1065_v25 = vpack.c.bf16 %v1057_v8, %v1057_v8 }
 0x399   :  { %1099 = vmatmul.mubr.bf16.vlgmr.msra.gmra.mrb[28].mxu0 %v1065_v25  ;;  %1140 = vmatmul.mubr.bf16.vlgmr.msra.gmra.mrb[28].mxu1 %v1065_v25 }
 0x39a   :  { %1185 = vmatpush1.bf16.msra.mxu0 %v2463_v36  ;;  %1226 = vmatpush1.bf16.msra.mxu1 %v2465_v37 }
 0x39b   :  { %1186 = vmatprep.subr.bf16.mxu0 %v2469_v38  ;;  %1227 = vmatprep.subr.bf16.mxu1 %v2471_v39 }
 0x39c   :  { %1216 = vmatprep.mubr.bf16.mxu0 %v3027_v23  ;;  %1257 = vmatprep.mubr.bf16.mxu1 %v3027_v23 }
 0x39e   :  { %1187 = vmatpush1.bf16.msra.mxu0 %v2473_v40  ;;  %1228 = vmatpush1.bf16.msra.mxu1 %v2477_v41 }
 0x39f   :  { %1188 = vmatprep.subr.bf16.mxu0 %v2481_v42  ;;  %1229 = vmatprep.subr.bf16.mxu1 %v2483_v43 }
 0x3a2   :  { %1189 = vmatpush1.bf16.msra.mxu0 %v2487_v45  ;;  %1230 = vmatpush1.bf16.msra.mxu1 %v2489_v46 }
 0x3a3   :  { %1190 = vmatprep.subr.bf16.mxu0 %v2493_v47  ;;  %1231 = vmatprep.subr.bf16.mxu1 %v2497_v48 }
 0x3a6   :  { %1191 = vmatpush1.bf16.msra.mxu0 %v2499_v49  ;;  %1232 = vmatpush1.bf16.msra.mxu1 %v2501_v50 }
 0x3a7   :  { %1192 = vmatprep.subr.bf16.mxu0 %v2505_v51  ;;  %1233 = vmatprep.subr.bf16.mxu1 %v2509_v52 }
 0x3aa   :  { %1193 = vmatpush1.bf16.msra.mxu0 %v2515_v54  ;;  %1234 = vmatpush1.bf16.msra.mxu1 %v2517_v55 }
 0x3ab   :  { %1194 = vmatprep.subr.bf16.mxu0 %v2521_v56  ;;  %1235 = vmatprep.subr.bf16.mxu1 %v2523_v57 }
 0x3ae   :  { %1195 = vmatpush1.bf16.msra.mxu0 %v2527_v58  ;;  %1236 = vmatpush1.bf16.msra.mxu1 %v2529_v59 }
 0x3af   :  { %1196 = vmatprep.subr.bf16.mxu0 %v2533_v60  ;;  %1237 = vmatprep.subr.bf16.mxu1 %v2535_v61 }
 0x3b2   :  { %1197 = vmatpush1.bf16.msra.mxu0 %v2541_v63  ;;  %1238 = vmatpush1.bf16.msra.mxu1 %v2543_v1 }
 0x3b3   :  { %1198 = vmatprep.subr.bf16.mxu0 %v2547_v2  ;;  %1239 = vmatprep.subr.bf16.mxu1 %v2549_v3 }
 0x3b6   :  { %1199 = vmatpush1.bf16.msra.mxu0 %v2553_v4  ;;  %1240 = vmatpush1.bf16.msra.mxu1 %v2555_v5 }
 0x3b7   :  { %1302 = vmatprep.subr.bf16.mxu0 %v2459_v33  ;;  %1343 = vmatprep.subr.bf16.mxu1 %v2461_v34 }
 0x46c   :  { %v1100_v31 = vpop.f32.mrb[28].mxu0  ;;  %v1141_v35 = vpop.f32.mrb[28].mxu1 }
 0x46d   :  { %v1148_v14 = vadd.f32 %v1100_v31, %v3029_v15  ;;  %v1150_v18 = vadd.f32 %v1141_v35, %v3030_v16  ;;  %v1102_v17 = vpop.f32.mrb[29].mxu0  ;;  %v1143_v19 = vpop.f32.mrb[29].mxu1 }
 0x46e   :  { %v1149_v20 = vadd.f32 %v1102_v17, %v3031_v0  ;;  %v1151_v30 = vadd.f32 %v1143_v19, %v3032_v21  ;;  %v1104_v10 = vpop.f32.mrb[30].mxu0  ;;  %v1145_v24 = vpop.f32.mrb[30].mxu1 }
 0x46f   :  { %v1857_v26 = vmul.f32 -1.442695, %v1148_v14  ;;  %v1105_v28 = vpop.f32.mrb[31].mxu0  ;;  %v1146_v7 = vpop.f32.mrb[31].mxu1 }
 0x470   :  { %v1858_v33 = vmul.f32 -1.442695, %v1149_v20  ;;  %v1859_v34 = vmul.f32 -1.442695, %v1151_v30 }
 0x471   :  { %2112 = vpow2.f32 %v1857_v26 }
 0x472   :  { %2114 = vpow2.f32 %v1858_v33 }
 0x473   :  { %2116 = vpow2.f32 %v1859_v34 }
 0x474   :  { %2118 = vtanh.f32 %v1150_v18 }
 0x47b   :  { %v2113_v32 = vpop.eup %2112 }
 0x47c   :  { %v2115_v44 = vpop.eup %2114  ;;  %v1155_v62 = vadd.f32 1.0, %v2113_v32 }
 0x47d   :  { %v1161_v29 = vadd.f32 1.0, %v2115_v44  ;;  %v2117_v27 = vpop.eup %2116 }
 0x47e   :  { %2120 = vrcp.f32 %v1155_v62  ;;  %v2119_v12 = vpop.eup %2118  ;;  %v1168_v9 = vadd.f32 1.0, %v2117_v27  ;;  %v2861_v62 = vld [vmem:[#allocation10] ss:$16 sps:$4 sm:$0xff]   ;;  %v2867_v27 = vld [vmem:[#allocation10 + $0x24] ss:$16 sps:$4 sm:$0xff]  }
 0x47f   :  { %2122 = vrcp.f32 %v1161_v29  ;;  %v2864_v29 = vld [vmem:[#allocation10 + $0x8] ss:$16 sps:$4 sm:$0xff]  }
 0x480   :  { %2124 = vrcp.f32 %v1168_v9  ;;  %v2884_v9 = vld [vmem:[#allocation10 + $0x4c] ss:$16 sps:$4 sm:$0xff]  }
 0x488   :  { %v2121_v53 = vpop.eup %2120 }
 0x489   :  { %v2123_v11 = vpop.eup %2122  ;;  %v1172_v22 = vmul.f32 %v2121_v53, %v2119_v12  ;;  %v2870_v12 = vld [vmem:[#allocation10 + $0x2c] ss:$16 sps:$4 sm:$0xff]   ;;  %v2875_v53 = vld [vmem:[#allocation10 + $0x20] ss:$16 sps:$4 sm:$0xff]  }
 0x48a   :  { %v1171_v13 = vmul.f32 %v2123_v11, %v2770_v6  ;;  %v2125_v25 = vpop.eup %2124  ;;  %v2878_v11 = vld [vmem:[#allocation10 + $0x28] ss:$16 sps:$4 sm:$0xff]  }
 0x48c   :  { %v2812_v8 = vadd.f32 %v1172_v22, %v1171_v13  ;;  %v2881_v22 = vld [vmem:[#allocation10 + $0x44] ss:$16 sps:$4 sm:$0xff]   ;;  %v2887_v13 = vld [vmem:[#allocation10 + $0x40] ss:$16 sps:$4 sm:$0xff]  }
 0x48e   :  { %2126 = vtanh.f32 %v2812_v8 }
 0x498   :  { %v2127_v31 = vpop.eup %2126 }
 0x499   :  { %v1175_v35 = vmul.f32 %v2127_v31, %v2125_v25  ;;  %v2893_v25 = vld [vmem:[#allocation10 + $0x64] ss:$16 sps:$4 sm:$0xff]   ;;  %v2896_v31 = vld [vmem:[#allocation10 + $0x6c] ss:$16 sps:$4 sm:$0xff]  }
 0x49b   :  { %v1183_v15 = vpack.c.bf16 %v1175_v35, %v1175_v35  ;;  %v2899_v35 = vld [vmem:[#allocation10 + $0x60] ss:$16 sps:$4 sm:$0xff]  }
 0x49d   :  { %1217 = vmatmul.mubr.bf16.vlgmr.msra.gmra.mrb[32].mxu0 %v1183_v15  ;;  %1258 = vmatmul.mubr.bf16.vlgmr.msra.gmra.mrb[32].mxu1 %v1183_v15  ;;  %v2902_v15 = vld [vmem:[#allocation10 + $0x68] ss:$16 sps:$4 sm:$0xff]  }
 0x49e   :  { %1303 = vmatpush1.bf16.msra.mxu0 %v2463_v36  ;;  %1344 = vmatpush1.bf16.msra.mxu1 %v2465_v37  ;;  %v2847_v36 = vld [vmem:[#allocation10 + $0x4] ss:$16 sps:$4 sm:$0xff]   ;;  %v2850_v37 = vld [vmem:[#allocation10 + $0xc] ss:$16 sps:$4 sm:$0xff]  }
 0x49f   :  { %1304 = vmatprep.subr.bf16.mxu0 %v2469_v38  ;;  %1345 = vmatprep.subr.bf16.mxu1 %v2471_v39 }
 0x4a0   :  { %1334 = vmatprep.mubr.bf16.mxu0 %v3027_v23  ;;  %1375 = vmatprep.mubr.bf16.mxu1 %v3027_v23 }
 0x4a2   :  { %1305 = vmatpush1.bf16.msra.mxu0 %v2473_v40  ;;  %1346 = vmatpush1.bf16.msra.mxu1 %v2477_v41  ;;  %v3033_v40 = vld [vmem:[#allocation23_spill] sm:$0xff] }
 0x4a3   :  { %1306 = vmatprep.subr.bf16.mxu0 %v2481_v42  ;;  %1347 = vmatprep.subr.bf16.mxu1 %v2483_v43  ;;  %v3034_v42 = vld [vmem:[#allocation24_spill] sm:$0xff] }
 0x4a6   :  { %1307 = vmatpush1.bf16.msra.mxu0 %v2487_v45  ;;  %1348 = vmatpush1.bf16.msra.mxu1 %v2489_v46 }
 0x4a7   :  { %1308 = vmatprep.subr.bf16.mxu0 %v2493_v47  ;;  %1349 = vmatprep.subr.bf16.mxu1 %v2497_v48  ;;  %v3035_v47 = vld [vmem:[#allocation25_spill] sm:$0xff] }
 0x4aa   :  { %1309 = vmatpush1.bf16.msra.mxu0 %v2499_v49  ;;  %1350 = vmatpush1.bf16.msra.mxu1 %v2501_v50  ;;  %v3036_v49 = vld [vmem:[#allocation26_spill] sm:$0xff] }
 0x4ab   :  { %1310 = vmatprep.subr.bf16.mxu0 %v2505_v51  ;;  %1351 = vmatprep.subr.bf16.mxu1 %v2509_v52 }
 0x4ae   :  { %1311 = vmatpush1.bf16.msra.mxu0 %v2515_v54  ;;  %1352 = vmatpush1.bf16.msra.mxu1 %v2517_v55 }
 0x4af   :  { %1312 = vmatprep.subr.bf16.mxu0 %v2521_v56  ;;  %1353 = vmatprep.subr.bf16.mxu1 %v2523_v57 }
 0x4b2   :  { %1313 = vmatpush1.bf16.msra.mxu0 %v2527_v58  ;;  %1354 = vmatpush1.bf16.msra.mxu1 %v2529_v59 }
 0x4b3   :  { %1314 = vmatprep.subr.bf16.mxu0 %v2533_v60  ;;  %1355 = vmatprep.subr.bf16.mxu1 %v2535_v61 }
 0x4b6   :  { %1315 = vmatpush1.bf16.msra.mxu0 %v2541_v63  ;;  %1356 = vmatpush1.bf16.msra.mxu1 %v2543_v1 }
 0x4b7   :  { %1316 = vmatprep.subr.bf16.mxu0 %v2547_v2  ;;  %1357 = vmatprep.subr.bf16.mxu1 %v2549_v3 }
 0x4ba   :  { %1317 = vmatpush1.bf16.msra.mxu0 %v2553_v4  ;;  %1358 = vmatpush1.bf16.msra.mxu1 %v2555_v5 }
 0x4bb   :  { %1420 = vmatprep.subr.bf16.mxu0 %v2847_v36  ;;  %1461 = vmatprep.subr.bf16.mxu1 %v2850_v37 }
 0x570   :  { %v1218_v38 = vpop.f32.mrb[32].mxu0  ;;  %v1259_v39 = vpop.f32.mrb[32].mxu1 }
 0x571   :  { %v1266_v41 = vadd.f32 %v1218_v38, %v3033_v40  ;;  %v1268_v43 = vadd.f32 %v1259_v39, %v3034_v42  ;;  %v1220_v45 = vpop.f32.mrb[33].mxu0  ;;  %v1261_v46 = vpop.f32.mrb[33].mxu1  ;;  %v2905_v38 = vld [vmem:[#allocation10 + $0x84] ss:$16 sps:$4 sm:$0xff]   ;;  %v2908_v39 = vld [vmem:[#allocation10 + $0x8c] ss:$16 sps:$4 sm:$0xff]  }
 0x572   :  { %v1267_v48 = vadd.f32 %v1220_v45, %v3035_v47  ;;  %v1269_v50 = vadd.f32 %v1261_v46, %v3036_v49  ;;  %v1222_v51 = vpop.f32.mrb[34].mxu0  ;;  %v1263_v52 = vpop.f32.mrb[34].mxu1  ;;  %v2911_v40 = vld [vmem:[#allocation10 + $0x80] ss:$16 sps:$4 sm:$0xff]  }
 0x573   :  { %v1860_v54 = vmul.f32 -1.442695, %v1266_v41  ;;  %v1223_v55 = vpop.f32.mrb[35].mxu0  ;;  %v1264_v6 = vpop.f32.mrb[35].mxu1  ;;  %v2914_v41 = vld [vmem:[#allocation10 + $0x88] ss:$16 sps:$4 sm:$0xff]  }
 0x574   :  { %v1861_v14 = vmul.f32 -1.442695, %v1267_v48  ;;  %v1862_v16 = vmul.f32 -1.442695, %v1269_v50  ;;  %v3039_v42 = vld [vmem:[#allocation29_spill] sm:$0xff] }
 0x575   :  { %2128 = vpow2.f32 %v1860_v54 }
 0x576   :  { %2130 = vpow2.f32 %v1861_v14 }
 0x577   :  { %2132 = vpow2.f32 %v1862_v16 }
 0x578   :  { %2134 = vtanh.f32 %v1268_v43  ;;  %v3040_v43 = vld [vmem:[#allocation30_spill] sm:$0xff] }
 0x57f   :  { %v2129_v18 = vpop.eup %2128 }
 0x580   :  { %v2131_v17 = vpop.eup %2130  ;;  %v1273_v19 = vadd.f32 1.0, %v2129_v18 }
 0x581   :  { %v1279_v0 = vadd.f32 1.0, %v2131_v17  ;;  %v2133_v20 = vpop.eup %2132 }
 0x582   :  { %2136 = vrcp.f32 %v1273_v19  ;;  %v2135_v21 = vpop.eup %2134  ;;  %v1286_v26 = vadd.f32 1.0, %v2133_v20 }
 0x583   :  { %2138 = vrcp.f32 %v1279_v0 }
 0x584   :  { %2140 = vrcp.f32 %v1286_v26  ;;  %v2220_v26 = vld [vmem:[#allocation10 + $0xc4] ss:$16 sps:$4 sm:$0xff]  }
 0x58c   :  { %v2137_v30 = vpop.eup %2136 }
 0x58d   :  { %v2139_v10 = vpop.eup %2138  ;;  %v1290_v24 = vmul.f32 %v2137_v30, %v2135_v21  ;;  %v2217_v30 = vld [vmem:[#allocation10 + $0xac] ss:$16 sps:$4 sm:$0xff]  }
 0x58e   :  { %v1289_v28 = vmul.f32 %v2139_v10, %v2812_v8  ;;  %v2141_v33 = vpop.eup %2140  ;;  %v2890_v8 = vld [vmem:[#allocation10 + $0x48] ss:$16 sps:$4 sm:$0xff]   ;;  %v2218_v10 = vld [vmem:[#allocation10 + $0xa0] ss:$16 sps:$4 sm:$0xff]  }
 0x590   :  { %v2858_v7 = vadd.f32 %v1290_v24, %v1289_v28  ;;  %v2219_v24 = vld [vmem:[#allocation10 + $0xa8] ss:$16 sps:$4 sm:$0xff]   ;;  %v2221_v28 = vld [vmem:[#allocation10 + $0xcc] ss:$16 sps:$4 sm:$0xff]  }
 0x592   :  { %2142 = vtanh.f32 %v2858_v7 }
 0x59c   :  { %v2143_v34 = vpop.eup %2142 }
 0x59d   :  { %v1293_v32 = vmul.f32 %v2143_v34, %v2141_v33  ;;  %v2223_v33 = vld [vmem:[#allocation10 + $0xc8] ss:$16 sps:$4 sm:$0xff]   ;;  %v2224_v34 = vld [vmem:[#allocation10 + $0xe4] ss:$16 sps:$4 sm:$0xff]  }
 0x59f   :  { %v1301_v44 = vpack.c.bf16 %v1293_v32, %v1293_v32  ;;  %v2225_v32 = vld [vmem:[#allocation10 + $0xec] ss:$16 sps:$4 sm:$0xff]  }
 0x5a1   :  { %1335 = vmatmul.mubr.bf16.vlgmr.msra.gmra.mrb[36].mxu0 %v1301_v44  ;;  %1376 = vmatmul.mubr.bf16.vlgmr.msra.gmra.mrb[36].mxu1 %v1301_v44  ;;  %v2226_v44 = vld [vmem:[#allocation10 + $0xe0] ss:$16 sps:$4 sm:$0xff]  }
 0x5a2   :  { %1421 = vmatpush1.bf16.msra.mxu0 %v2861_v62  ;;  %1462 = vmatpush1.bf16.msra.mxu1 %v2864_v29 }
 0x5a3   :  { %1422 = vmatprep.subr.bf16.mxu0 %v2867_v27  ;;  %1463 = vmatprep.subr.bf16.mxu1 %v2870_v12 }
 0x5a4   :  { %1452 = vmatprep.mubr.bf16.mxu0 %v3027_v23  ;;  %1493 = vmatprep.mubr.bf16.mxu1 %v3027_v23 }
 0x5a6   :  { %1423 = vmatpush1.bf16.msra.mxu0 %v2875_v53  ;;  %1464 = vmatpush1.bf16.msra.mxu1 %v2878_v11 }
 0x5a7   :  { %1424 = vmatprep.subr.bf16.mxu0 %v2881_v22  ;;  %1465 = vmatprep.subr.bf16.mxu1 %v2884_v9 }
 0x5aa   :  { %1425 = vmatpush1.bf16.msra.mxu0 %v2887_v13  ;;  %1466 = vmatpush1.bf16.msra.mxu1 %v2890_v8 }
 0x5ab   :  { %1426 = vmatprep.subr.bf16.mxu0 %v2893_v25  ;;  %1467 = vmatprep.subr.bf16.mxu1 %v2896_v31 }
 0x5ae   :  { %1427 = vmatpush1.bf16.msra.mxu0 %v2899_v35  ;;  %1468 = vmatpush1.bf16.msra.mxu1 %v2902_v15 }
 0x5af   :  { %1428 = vmatprep.subr.bf16.mxu0 %v2905_v38  ;;  %1469 = vmatprep.subr.bf16.mxu1 %v2908_v39 }
 0x5b2   :  { %1429 = vmatpush1.bf16.msra.mxu0 %v2911_v40  ;;  %1470 = vmatpush1.bf16.msra.mxu1 %v2914_v41 }
 0x5b3   :  { %1430 = vmatprep.subr.bf16.mxu0 %v2521_v56  ;;  %1471 = vmatprep.subr.bf16.mxu1 %v2523_v57 }
 0x5b6   :  { %1431 = vmatpush1.bf16.msra.mxu0 %v2527_v58  ;;  %1472 = vmatpush1.bf16.msra.mxu1 %v2529_v59  ;;  %v3037_v58 = vld [vmem:[#allocation27_spill] sm:$0xff] }
 0x5b7   :  { %1432 = vmatprep.subr.bf16.mxu0 %v2533_v60  ;;  %1473 = vmatprep.subr.bf16.mxu1 %v2535_v61  ;;  %v3038_v60 = vld [vmem:[#allocation28_spill] sm:$0xff] }
 0x5ba   :  { %1433 = vmatpush1.bf16.msra.mxu0 %v2541_v63  ;;  %1474 = vmatpush1.bf16.msra.mxu1 %v2543_v1 }
 0x5bb   :  { %1434 = vmatprep.subr.bf16.mxu0 %v2547_v2  ;;  %1475 = vmatprep.subr.bf16.mxu1 %v2549_v3 }
 0x5be   :  { %1435 = vmatpush1.bf16.msra.mxu0 %v2553_v4  ;;  %1476 = vmatpush1.bf16.msra.mxu1 %v2555_v5 }
 0x5bf   :  { %1538 = vmatprep.subr.bf16.mxu0 %v2847_v36  ;;  %1579 = vmatprep.subr.bf16.mxu1 %v2850_v37 }
 0x674   :  { %v1336_v56 = vpop.f32.mrb[36].mxu0  ;;  %v1377_v57 = vpop.f32.mrb[36].mxu1 }
 0x675   :  { %v1384_v59 = vadd.f32 %v1336_v56, %v3037_v58  ;;  %v1386_v61 = vadd.f32 %v1377_v57, %v3038_v60  ;;  %v1338_v63 = vpop.f32.mrb[37].mxu0  ;;  %v1379_v1 = vpop.f32.mrb[37].mxu1 }
 0x676   :  { %v1385_v2 = vadd.f32 %v1338_v63, %v3039_v42  ;;  %v1387_v3 = vadd.f32 %v1379_v1, %v3040_v43  ;;  %v1340_v45 = vpop.f32.mrb[38].mxu0  ;;  %v1381_v4 = vpop.f32.mrb[38].mxu1 }
 0x677   :  { %v1863_v46 = vmul.f32 -1.442695, %v1384_v59  ;;  %v1341_v5 = vpop.f32.mrb[39].mxu0  ;;  %v1382_v47 = vpop.f32.mrb[39].mxu1 }
 0x678   :  { %v1864_v36 = vmul.f32 -1.442695, %v1385_v2  ;;  %v1865_v37 = vmul.f32 -1.442695, %v1387_v3 }
 0x679   :  { %2144 = vpow2.f32 %v1863_v46 }
 0x67a   :  { %2146 = vpow2.f32 %v1864_v36 }
 0x67b   :  { %2148 = vpow2.f32 %v1865_v37 }
 0x67c   :  { %2150 = vtanh.f32 %v1386_v61 }
 0x683   :  { %v2145_v48 = vpop.eup %2144 }
 0x684   :  { %v2147_v49 = vpop.eup %2146  ;;  %v1391_v50 = vadd.f32 1.0, %v2145_v48  ;;  %v1653_v48 = vld [vmem:[#allocation11] sm:$0xff] }
 0x685   :  { %v1397_v51 = vadd.f32 1.0, %v2147_v49  ;;  %v2149_v52 = vpop.eup %2148  ;;  %v1654_v49 = vld [vmem:[#allocation11 + $0x8] sm:$0xff] }
 0x686   :  { %2152 = vrcp.f32 %v1391_v50  ;;  %v2151_v54 = vpop.eup %2150  ;;  %v1404_v16 = vadd.f32 1.0, %v2149_v52  ;;  %v1926_v50 = vpack.c.bf16 %v1654_v49, %v1653_v48  ;;  %v1656_v52 = vld [vmem:[#allocation11 + $0x18] sm:$0xff] }
 0x687   :  { %2154 = vrcp.f32 %v1397_v51  ;;  %v1655_v51 = vld [vmem:[#allocation11 + $0x10] sm:$0xff] }
 0x688   :  { %2156 = vrcp.f32 %v1404_v16  ;;  %v1659_v16 = vld [vmem:[#allocation11 + $0x30] sm:$0xff] }
 0x690   :  { %v2153_v55 = vpop.eup %2152 }
 0x691   :  { %v2155_v6 = vpop.eup %2154  ;;  %v1408_v14 = vmul.f32 %v2153_v55, %v2151_v54  ;;  %v1929_v54 = vpack.c.bf16 %v1656_v52, %v1655_v51  ;;  %v1657_v55 = vld [vmem:[#allocation11 + $0x20] sm:$0xff] }
 0x692   :  { %v1407_v18 = vmul.f32 %v2155_v6, %v2858_v7  ;;  %v2157_v19 = vpop.eup %2156  ;;  %v2222_v7 = vld [vmem:[#allocation10 + $0xc0] ss:$16 sps:$4 sm:$0xff]   ;;  %v1658_v6 = vld [vmem:[#allocation11 + $0x28] sm:$0xff] }
 0x694   :  { %v2936_v17 = vadd.f32 %v1408_v14, %v1407_v18  ;;  %v1932_v14 = vpack.c.bf16 %v1658_v6, %v1657_v55  ;;  %v1660_v18 = vld [vmem:[#allocation11 + $0x38] sm:$0xff] }
 0x696   :  { %2158 = vtanh.f32 %v2936_v17 }
 0x6a0   :  { %v2159_v0 = vpop.eup %2158 }
 0x6a1   :  { %v1411_v20 = vmul.f32 %v2159_v0, %v2157_v19  ;;  %v1661_v19 = vld [vmem:[#allocation11 + $0x40] sm:$0xff]  ;;  %v1662_v0 = vld [vmem:[#allocation11 + $0x48] sm:$0xff] }
 0x6a3   :  { %v1419_v21 = vpack.c.bf16 %v1411_v20, %v1411_v20  ;;  %v1938_v20 = vpack.c.bf16 %v1662_v0, %v1661_v19 }
 0x6a5   :  { %1453 = vmatmul.mubr.bf16.vlgmr.msra.gmra.mrb[40].mxu0 %v1419_v21  ;;  %1494 = vmatmul.mubr.bf16.vlgmr.msra.gmra.mrb[40].mxu1 %v1419_v21  ;;  %v1663_v21 = vld [vmem:[#allocation11 + $0x50] sm:$0xff] }
 0x6a6   :  { %1539 = vmatpush1.bf16.msra.mxu0 %v2861_v62  ;;  %1580 = vmatpush1.bf16.msra.mxu1 %v2864_v29  ;;  %v2227_v62 = vld [vmem:[#allocation10 + $0xe8] ss:$16 sps:$4 sm:$0xff]   ;;  %v3041_v29 = vmov 0.0|0.0  }
 0x6a7   :  { %1540 = vmatprep.subr.bf16.mxu0 %v2867_v27  ;;  %1581 = vmatprep.subr.bf16.mxu1 %v2870_v12 }
 0x6a8   :  { %1570 = vmatprep.mubr.bf16.mxu0 %v3027_v23  ;;  %1611 = vmatprep.mubr.bf16.mxu1 %v3027_v23  ;;  %v2216_v23 = vld [vmem:[#allocation10 + $0xa4] ss:$16 sps:$4 sm:$0xff]  }
 0x6aa   :  { %1541 = vmatpush1.bf16.msra.mxu0 %v2875_v53  ;;  %1582 = vmatpush1.bf16.msra.mxu1 %v2878_v11  ;;  %v3042_v53 = vld [vmem:[#allocation31_spill] sm:$0xff] }
 0x6ab   :  { %1542 = vmatprep.subr.bf16.mxu0 %v2881_v22  ;;  %1583 = vmatprep.subr.bf16.mxu1 %v2884_v9  ;;  %v3043_v22 = vld [vmem:[#allocation32_spill] sm:$0xff] }
 0x6ae   :  { %1543 = vmatpush1.bf16.msra.mxu0 %v2887_v13  ;;  %1584 = vmatpush1.bf16.msra.mxu1 %v2890_v8 }
 0x6af   :  { %1544 = vmatprep.subr.bf16.mxu0 %v2893_v25  ;;  %1585 = vmatprep.subr.bf16.mxu1 %v2896_v31  ;;  %v3044_v25 = vld [vmem:[#allocation33_spill] sm:$0xff] }
 0x6b2   :  { %1545 = vmatpush1.bf16.msra.mxu0 %v2899_v35  ;;  %1586 = vmatpush1.bf16.msra.mxu1 %v2902_v15  ;;  %v3045_v35 = vld [vmem:[#allocation34_spill] sm:$0xff] }
 0x6b3   :  { %1546 = vmatprep.subr.bf16.mxu0 %v2905_v38  ;;  %1587 = vmatprep.subr.bf16.mxu1 %v2908_v39 }
 0x6b6   :  { %1547 = vmatpush1.bf16.msra.mxu0 %v2911_v40  ;;  %1588 = vmatpush1.bf16.msra.mxu1 %v2914_v41 }
 0x6b7   :  { %1548 = vmatprep.subr.bf16.mxu0 %v2216_v23  ;;  %1589 = vmatprep.subr.bf16.mxu1 %v2217_v30  ;;  %v1664_v23 = vld [vmem:[#allocation11 + $0x58] sm:$0xff]  ;;  %v1665_v30 = vld [vmem:[#allocation11 + $0x60] sm:$0xff] }
 0x6ba   :  { %1549 = vmatpush1.bf16.msra.mxu0 %v2218_v10  ;;  %1590 = vmatpush1.bf16.msra.mxu1 %v2219_v24  ;;  %v1941_v10 = vpack.c.bf16 %v1664_v23, %v1663_v21  ;;  %v1666_v24 = vld [vmem:[#allocation11 + $0x68] sm:$0xff] }
 0x6bb   :  { %1550 = vmatprep.subr.bf16.mxu0 %v2220_v26  ;;  %1591 = vmatprep.subr.bf16.mxu1 %v2221_v28  ;;  %v2359_v26 = vmov 0.0   ;;  %v1944_v28 = vpack.c.bf16 %v1666_v24, %v1665_v30 }
 0x6be   :  { %1551 = vmatpush1.bf16.msra.mxu0 %v2222_v7  ;;  %1592 = vmatpush1.bf16.msra.mxu1 %v2223_v33  ;;  %v1667_v7 = vld [vmem:[#allocation11 + $0x70] sm:$0xff]  ;;  %v1668_v33 = vld [vmem:[#allocation11 + $0x78] sm:$0xff] }
 0x6bf   :  { %1552 = vmatprep.subr.bf16.mxu0 %v2224_v34  ;;  %1593 = vmatprep.subr.bf16.mxu1 %v2225_v32  ;;  %v1947_v34 = vpack.c.bf16 %v1668_v33, %v1667_v7 }
 0x6c2   :  { %1553 = vmatpush1.bf16.msra.mxu0 %v2226_v44  ;;  %1594 = vmatpush1.bf16.msra.mxu1 %v2227_v62  ;;  %v3046_v62 = vld [vmem:[#allocation35_spill] sm:$0xff] }
 0x6c3   :  { %1925 = vmatprep.subr.bf16.mxu0 %v3041_v29 }
 0x778   :  { %v1454_v27 = vpop.f32.mrb[40].mxu0  ;;  %v1495_v12 = vpop.f32.mrb[40].mxu1 }
 0x779   :  { %v1502_v11 = vadd.f32 %v1454_v27, %v3042_v53  ;;  %v1504_v9 = vadd.f32 %v1495_v12, %v3043_v22  ;;  %v1456_v13 = vpop.f32.mrb[41].mxu0  ;;  %v1497_v8 = vpop.f32.mrb[41].mxu1  ;;  %v3047_v12 = vld [vmem:[#allocation36_spill] sm:$0xff] }
 0x77a   :  { %v1503_v31 = vadd.f32 %v1456_v13, %v3044_v25  ;;  %v1505_v15 = vadd.f32 %v1497_v8, %v3045_v35  ;;  %v1458_v38 = vpop.f32.mrb[42].mxu0  ;;  %v1499_v39 = vpop.f32.mrb[42].mxu1  ;;  %v3049_v8 = vld [vmem:[#allocation38_spill] sm:$0xff] }
 0x77b   :  { %v1866_v40 = vmul.f32 -1.442695, %v1502_v11  ;;  %v1459_v41 = vpop.f32.mrb[43].mxu0  ;;  %v1500_v56 = vpop.f32.mrb[43].mxu1 }
 0x77c   :  { %v1867_v57 = vmul.f32 -1.442695, %v1503_v31  ;;  %v1868_v58 = vmul.f32 -1.442695, %v1505_v15 }
 0x77d   :  { %2160 = vpow2.f32 %v1866_v40 }
 0x77e   :  { %2162 = vpow2.f32 %v1867_v57 }
 0x77f   :  { %2164 = vpow2.f32 %v1868_v58 }
 0x780   :  { %2166 = vtanh.f32 %v1504_v9  ;;  %v3048_v9 = vld [vmem:[#allocation37_spill] sm:$0xff] }
 0x787   :  { %v2161_v59 = vpop.eup %2160 }
 0x788   :  { %v2163_v60 = vpop.eup %2162  ;;  %v1509_v61 = vadd.f32 1.0, %v2161_v59 }
 0x789   :  { %v1515_v63 = vadd.f32 1.0, %v2163_v60  ;;  %v2165_v1 = vpop.eup %2164 }
 0x78a   :  { %2168 = vrcp.f32 %v1509_v61  ;;  %v2167_v42 = vpop.eup %2166  ;;  %v1522_v45 = vadd.f32 1.0, %v2165_v1 }
 0x78b   :  { %2170 = vrcp.f32 %v1515_v63 }
 0x78c   :  { %2172 = vrcp.f32 %v1522_v45 }
 0x794   :  { %v2169_v2 = vpop.eup %2168 }
 0x795   :  { %v2171_v43 = vpop.eup %2170  ;;  %v1526_v3 = vmul.f32 %v2169_v2, %v2167_v42 }
 0x796   :  { %v1525_v4 = vmul.f32 %v2171_v43, %v2936_v17  ;;  %v2173_v5 = vpop.eup %2172  ;;  %v1935_v17 = vpack.c.bf16 %v1660_v18, %v1659_v16 }
 0x798   :  { %v2965_v46 = vadd.f32 %v1526_v3, %v1525_v4 }
 0x79a   :  { %2174 = vtanh.f32 %v2965_v46 }
 0x7a4   :  { %v2175_v47 = vpop.eup %2174 }
 0x7a5   :  { %v1529_v36 = vmul.f32 %v2175_v47, %v2173_v5  ;;  %v1872_v5 = vld [vmem:[%s3000_s5] ss:$0 sm:$0xff] }
 0x7a7   :  { %v1537_v37 = vpack.c.bf16 %v1529_v36, %v1529_v36 }
 0x7a9   :  { %1571 = vmatmul.mubr.bf16.vlgmr.msra.gmra.mrb[44].mxu0 %v1537_v37  ;;  %1612 = vmatmul.mubr.bf16.vlgmr.msra.gmra.mrb[44].mxu1 %v1537_v37 }
 0x7aa   :  { %1927 = vmatpush3.bf16.msra.mxu0 %v1926_v50  ;;  %1922 = vmatprep.mubr.msk.f32.mxu0 %vm2358_vm0, %v2359_v26 }
 0x7ab   :  { %1928 = vmatprep.subr.bf16.mxu0 %v3041_v29 }
 0x7ae   :  { %1930 = vmatpush3.bf16.msra.mxu0 %v1929_v54 }
 0x7af   :  { %1931 = vmatprep.subr.bf16.mxu0 %v3041_v29 }
 0x7b2   :  { %1933 = vmatpush3.bf16.msra.mxu0 %v1932_v14 }
 0x7b3   :  { %1934 = vmatprep.subr.bf16.mxu0 %v3041_v29 }
 0x7b6   :  { %1936 = vmatpush3.bf16.msra.mxu0 %v1935_v17 }
 0x7b7   :  { %1937 = vmatprep.subr.bf16.mxu0 %v3041_v29 }
 0x7ba   :  { %1939 = vmatpush3.bf16.msra.mxu0 %v1938_v20 }
 0x7bb   :  { %1940 = vmatprep.subr.bf16.mxu0 %v3041_v29 }
 0x7be   :  { %1942 = vmatpush3.bf16.msra.mxu0 %v1941_v10 }
 0x7bf   :  { %1943 = vmatprep.subr.bf16.mxu0 %v3041_v29 }
 0x7c2   :  { %1945 = vmatpush3.bf16.msra.mxu0 %v1944_v28 }
 0x7c3   :  { %1946 = vmatprep.subr.bf16.mxu0 %v3041_v29 }
 0x7c6   :  { %1948 = vmatpush3.bf16.msra.mxu0 %v1947_v34 }
 0x87c   :  { %v1572_v32 = vpop.f32.mrb[44].mxu0  ;;  %v1613_v44 = vpop.f32.mrb[44].mxu1 }
 0x87d   :  { %v1620_v27 = vadd.f32 %v1572_v32, %v3046_v62  ;;  %v1622_v53 = vadd.f32 %v1613_v44, %v3047_v12  ;;  %v1574_v11 = vpop.f32.mrb[45].mxu0  ;;  %v1615_v22 = vpop.f32.mrb[45].mxu1 }
 0x87e   :  { %v1621_v13 = vadd.f32 %v1574_v11, %v3048_v9  ;;  %v1623_v25 = vadd.f32 %v1615_v22, %v3049_v8  ;;  %v1576_v31 = vpop.f32.mrb[46].mxu0  ;;  %v1617_v35 = vpop.f32.mrb[46].mxu1 }
 0x87f   :  { %v1869_v15 = vmul.f32 -1.442695, %v1620_v27  ;;  %v1577_v38 = vpop.f32.mrb[47].mxu0  ;;  %v1618_v39 = vpop.f32.mrb[47].mxu1 }
 0x880   :  { %v1870_v40 = vmul.f32 -1.442695, %v1621_v13  ;;  %v1871_v29 = vmul.f32 -1.442695, %v1623_v25 }
 0x881   :  { %2176 = vpow2.f32 %v1869_v15 }
 0x882   :  { %2178 = vpow2.f32 %v1870_v40 }
 0x883   :  { %2180 = vpow2.f32 %v1871_v29 }
 0x884   :  { %2182 = vtanh.f32 %v1622_v53 }
 0x88b   :  { %v2177_v41 = vpop.eup %2176 }
 0x88c   :  { %v2179_v56 = vpop.eup %2178  ;;  %v1627_v57 = vadd.f32 1.0, %v2177_v41 }
 0x88d   :  { %v1633_v58 = vadd.f32 1.0, %v2179_v56  ;;  %v2181_v59 = vpop.eup %2180 }
 0x88e   :  { %2184 = vrcp.f32 %v1627_v57  ;;  %v2183_v60 = vpop.eup %2182  ;;  %v1640_v42 = vadd.f32 1.0, %v2181_v59 }
 0x88f   :  { %2186 = vrcp.f32 %v1633_v58 }
 0x890   :  { %2188 = vrcp.f32 %v1640_v42 }
 0x898   :  { %v2185_v61 = vpop.eup %2184 }
 0x899   :  { %v2187_v63 = vpop.eup %2186  ;;  %v1644_v1 = vmul.f32 %v2185_v61, %v2183_v60 }
 0x89a   :  { %v1643_v2 = vmul.f32 %v2187_v63, %v2965_v46  ;;  %v2189_v3 = vpop.eup %2188 }
 0x89c   :  { %v1645_v43 = vadd.f32 %v1644_v1, %v1643_v2 }
 0x89e   :  { %2190 = vtanh.f32 %v1645_v43 }
 0x8a8   :  { %v2191_v45 = vpop.eup %2190 }
 0x8a9   :  { %v1647_v4 = vmul.f32 %v2191_v45, %v2189_v3 }
 0x8ab   :  { %1923 = vmatmul.mubr.f32.vlgmr.msra.gmra.mrb[48].mxu0 %v1647_v4 }
 0x97e   :  { %v1742_v47 = vpop.f32.mrb[48].mxu0 }
 0x97f   :  { %v1743_v36 = vadd.f32 %v1872_v5, %v1742_v47  ;;  %v1924_v37 = vpop.f32.mrb[49].mxu0 }
 0x981   :  { %1746 = vmax.xlane.f32.xlu0 %v1743_v36 }
 0xa0e   :  { %v1747_v48 = vpop.xlane.xlu0 %1746 }
 0xa0f   :  { %v1748_v49 = vsub.f32 %v1743_v36, %v1747_v48 }
 0xa11   :  { %v1749_v50 = vmul.f32 1.442695, %v1748_v49 }
 0xa13   :  { %2192 = vpow2.f32 %v1749_v50 }
 0xa1d   :  { %v2193_v46 = vpop.eup %2192 }
 0xa1e   :  { %1751 = vadd.xlane.f32.xlu0 %v2193_v46 }
 0xaab   :  { %v1752_v51 = vpop.xlane.xlu0 %1751 }
 0xaac   :  { %2194 = vrcp.f32 %v1752_v51 }
 0xab6   :  { %v2195_v52 = vpop.eup %2194 }
 0xab7   :  { %v1754_v54 = vmul.f32 %v2195_v52, %v2193_v46 }
 0xab9   :  { %1755 = vst [vmem:[#allocation13] sm:$0xff] %v1754_v54 }
 0xaba   :  { %2327 = shalt.err (!%p2324_p8)
}
 0xabb   :  { %s2328_s29 = scalar_lea.hbm %s3001_s6, 128 }
 0xabc   :  { %p2329_p9 = scmp.ne.s32.totalorder %s3001_s6, %s2328_s29  ;;  %p2332_p10 = scmp.lt.u32.totalorder %s2328_s29, %s3001_s6 }
 0xabe   :  { %p2334_p11 = pnand %p2332_p10, %p2329_p9 }
 0xac0   :  { %2337 = shalt.err (!%p2334_p11)
}
 0xac1   :  { %1765 = dma.vmem_to_hbm [thread:$0]  %s1763_s26, 128, %s3001_s6, [#allocation7]  }
 0xac2   :  { %2344 = dma.done.wait [#allocation7], 128  }
 0xac3   :  { %2345 = vsyncadd [#allocation7], 4294967168 }
 0xac4   :  { %1769 = vsyncpa [#allocation6], 1 }
 0xac5   :  { %1770 = vsyncpa [#allocation9], 1 }
 0xac6   :  { %1771 = vsyncpa [#allocation12], 1 }
 0xac7   :  { %1772 = vsyncpa [#allocation7], 1 }

</bundles_post_ra>
